<compile_context>
chip_gen: v7x
topology: tpu7x:2x2x1
jax: 0.10.0
libtpu: 0.0.40
codegen_flags: <defaults>
</compile_context>

<pallas_src>
import jax
import jax.numpy as jnp
from jax import lax
from jax.experimental import pallas as pl
from jax.experimental.pallas import tpu as pltpu

NUM_HEADS = 4
LN_EPS = 1e-5     # nn.LayerNorm default eps


def _layer_norm(x, gamma, beta):
    mu = jnp.mean(x, axis=-1, keepdims=True)
    xc = x - mu
    var = jnp.mean(xc * xc, axis=-1, keepdims=True)
    return xc * lax.rsqrt(var + LN_EPS) * gamma + beta


def transformer_encoder_kernel(x_ref,
                               ln1g_ref, ln1b_ref,
                               wqkv_ref, bqkv_ref,
                               wproj_ref, bproj_ref,
                               ln2g_ref, ln2b_ref,
                               w1_ref, b1_ref,
                               w2_ref, b2_ref,
                               out_ref):
    N, D = x_ref.shape[1], x_ref.shape[2]
    H = NUM_HEADS
    hd = D // H
    scale = 1.0 / (hd ** 0.5)
    bf16 = jnp.bfloat16
    f32 = jnp.float32

    x = x_ref[0]                                            # (N, D) f32

    # ---- LayerNorm 1 + fused QKV projection (one MXU matmul, K = D) ----
    h = _layer_norm(x, ln1g_ref[...], ln1b_ref[...])
    qkv = jnp.dot(h.astype(bf16), wqkv_ref[...],
                  preferred_element_type=f32) + bqkv_ref[...]   # (N, 3D) f32

    # ---- multi-head attention (static loop over heads) ----
    proj = jnp.zeros((N, D), f32)
    for hh in range(H):
        q = qkv[:, hh * hd:(hh + 1) * hd].astype(bf16)           # (N, hd)
        k = qkv[:, D + hh * hd:D + (hh + 1) * hd].astype(bf16)
        v = qkv[:, 2 * D + hh * hd:2 * D + (hh + 1) * hd].astype(bf16)
        s = jnp.einsum('qd,kd->qk', q, k,
                       preferred_element_type=f32) * scale       # (N, N)
        s = s - jnp.max(s, axis=-1, keepdims=True)
        e = jnp.exp(s)
        p = (e / jnp.sum(e, axis=-1, keepdims=True)).astype(bf16)
        ctx = jnp.dot(p, v, preferred_element_type=f32)          # (N, hd)
        # fold this head's slice of the output projection directly in
        proj = proj + jnp.dot(ctx.astype(bf16),
                              wproj_ref[hh * hd:(hh + 1) * hd, :],
                              preferred_element_type=f32)
    x1 = x + proj + bproj_ref[...]                               # residual 1

    # ---- LayerNorm 2 + MLP ----
    h2 = _layer_norm(x1, ln2g_ref[...], ln2b_ref[...])
    m = jnp.dot(h2.astype(bf16), w1_ref[...],
                preferred_element_type=f32) + b1_ref[...]        # (N, 4D)
    # TODO(synk): PyTorch nn.GELU() is the exact erf GELU; tanh approximation
    # is used here since erf is not guaranteed to lower in Mosaic.
    m = jax.nn.gelu(m, approximate=True)
    y = jnp.dot(m.astype(bf16), w2_ref[...],
                preferred_element_type=f32) + b2_ref[...]
    out_ref[0] = x1 + y                                          # residual 2


def transformer_encoder_pallas(x, params):
    B, N, D = x.shape
    f32 = jnp.float32
    bf16 = jnp.bfloat16

    def row(v):                       # (C,) -> (1, C): lane-major broadcast row
        return v.astype(f32)[None, :]

    args = (
        x.astype(f32),
        row(params['ln1_g']), row(params['ln1_b']),
        params['wqkv'].astype(bf16), row(params['bqkv']),
        params['wproj'].astype(bf16), row(params['bproj']),
        row(params['ln2_g']), row(params['ln2_b']),
        params['w1'].astype(bf16), row(params['b1']),
        params['w2'].astype(bf16), row(params['b2']),
    )

    def full(shape):
        return pl.BlockSpec(shape, lambda b, _n=len(shape): (0,) * _n)

    in_specs = [pl.BlockSpec((1, N, D), lambda b: (b, 0, 0))]
    in_specs += [full(a.shape) for a in args[1:]]

    return pl.pallas_call(
        transformer_encoder_kernel,
        out_shape=jax.ShapeDtypeStruct((B, N, D), f32),
        grid_spec=pltpu.PrefetchScalarGridSpec(
            num_scalar_prefetch=0,
            grid=(B,),
            in_specs=in_specs,
            out_specs=pl.BlockSpec((1, N, D), lambda b: (b, 0, 0)),
        ),
        compiler_params=pltpu.CompilerParams(
            dimension_semantics=("parallel",),
            vmem_limit_bytes=64 * 1024 * 1024,
        ),
    )(*args)


def transformer_encoder_ref(x, params, eps=LN_EPS):
    """Pure-JAX f32 reference faithful to the PyTorch module (for checking)."""
    hp = lax.Precision.HIGHEST
    B, N, D = x.shape
    H = NUM_HEADS
    hd = D // H

    def ln(y, g, b):
        mu = y.mean(-1, keepdims=True)
        var = ((y - mu) ** 2).mean(-1, keepdims=True)
        return (y - mu) / jnp.sqrt(var + eps) * g + b

    h = ln(x, params['ln1_g'], params['ln1_b'])
    qkv = jnp.dot(h, params['wqkv'], precision=hp) + params['bqkv']
    qkv = qkv.reshape(B, N, 3, H, hd).transpose(2, 0, 3, 1, 4)
    q, k, v = qkv[0], qkv[1], qkv[2]                        # (B, H, N, hd)
    attn = jnp.einsum('bhqd,bhkd->bhqk', q, k, precision=hp) * (hd ** -0.5)
    attn = jax.nn.softmax(attn, axis=-1)
    ctx = jnp.einsum('bhqk,bhkd->bhqd', attn, v, precision=hp)
    ctx = ctx.transpose(0, 2, 1, 3).reshape(B, N, D)
    x1 = x + jnp.dot(ctx, params['wproj'], precision=hp) + params['bproj']
    h2 = ln(x1, params['ln2_g'], params['ln2_b'])
    m = jax.nn.gelu(jnp.dot(h2, params['w1'], precision=hp) + params['b1'],
                    approximate=False)                      # exact erf GELU
    y = jnp.dot(m, params['w2'], precision=hp) + params['b2']
    return x1 + y


if __name__ == "__main__":
    B, N, D = 2, 16, 128
    MLP_HIDDEN = 4 * D                                      # mlp_ratio = 4

    key = jax.random.PRNGKey(0)
    ks = jax.random.split(key, 13)
    p = dict(
        ln1_g=1.0 + 0.1 * jax.random.normal(ks[0], (D,), jnp.float32),
        ln1_b=0.05 * jax.random.normal(ks[1], (D,), jnp.float32),
        wqkv=0.05 * jax.random.normal(ks[2], (D, 3 * D), jnp.float32),
        bqkv=0.02 * jax.random.normal(ks[3], (3 * D,), jnp.float32),
        wproj=0.05 * jax.random.normal(ks[4], (D, D), jnp.float32),
        bproj=0.02 * jax.random.normal(ks[5], (D,), jnp.float32),
        ln2_g=1.0 + 0.1 * jax.random.normal(ks[6], (D,), jnp.float32),
        ln2_b=0.05 * jax.random.normal(ks[7], (D,), jnp.float32),
        w1=0.05 * jax.random.normal(ks[8], (D, MLP_HIDDEN), jnp.float32),
        b1=0.02 * jax.random.normal(ks[9], (MLP_HIDDEN,), jnp.float32),
        w2=0.05 * jax.random.normal(ks[10], (MLP_HIDDEN, D), jnp.float32),
        b2=0.02 * jax.random.normal(ks[11], (D,), jnp.float32),
    )
    x = jax.random.normal(ks[12], (B, N, D), jnp.float32)

    out = jax.block_until_ready(transformer_encoder_pallas(x, p))
    ref = jax.block_until_ready(transformer_encoder_ref(x, p))
    assert out.shape == ref.shape == (B, N, D), (out.shape, ref.shape)
    max_err = float(jnp.max(jnp.abs(out - ref)))
    assert max_err < 5e-2, f"max abs err {max_err}"
    print("KERNEL_OK")
</pallas_src>

<mosaic_0001>
module attributes {stable_mosaic.version = 11 : i64} {
  func.func @transformer_encoder_kernel(%arg0: i32, %arg1: memref<1x16x128xf32, #tpu.memory_space<vmem>>, %arg2: memref<1x128xf32, #tpu.memory_space<vmem>>, %arg3: memref<1x128xf32, #tpu.memory_space<vmem>>, %arg4: memref<128x384xbf16, #tpu.memory_space<vmem>>, %arg5: memref<1x384xf32, #tpu.memory_space<vmem>>, %arg6: memref<128x128xbf16, #tpu.memory_space<vmem>>, %arg7: memref<1x128xf32, #tpu.memory_space<vmem>>, %arg8: memref<1x128xf32, #tpu.memory_space<vmem>>, %arg9: memref<1x128xf32, #tpu.memory_space<vmem>>, %arg10: memref<128x512xbf16, #tpu.memory_space<vmem>>, %arg11: memref<1x512xf32, #tpu.memory_space<vmem>>, %arg12: memref<512x128xbf16, #tpu.memory_space<vmem>>, %arg13: memref<1x128xf32, #tpu.memory_space<vmem>>, %arg14: memref<1x16x128xf32, #tpu.memory_space<vmem>>) attributes {dimension_semantics = [#tpu.dimension_semantics<parallel>], iteration_bounds = array<i64: 2>, scalar_prefetch = 0 : i64, scratch_operands = 0 : i64, tpu.core_type = #tpu.core_type<tc>, window_params = [{transform_indices = @transform_0, window_bounds = array<i64: 1, 16, 128>}, {pipeline_mode = #tpu.pipeline_mode<synchronous>, transform_indices = @transform_1, window_bounds = array<i64: 1, 128>}, {pipeline_mode = #tpu.pipeline_mode<synchronous>, transform_indices = @transform_2, window_bounds = array<i64: 1, 128>}, {pipeline_mode = #tpu.pipeline_mode<synchronous>, transform_indices = @transform_3, window_bounds = array<i64: 128, 384>}, {pipeline_mode = #tpu.pipeline_mode<synchronous>, transform_indices = @transform_4, window_bounds = array<i64: 1, 384>}, {pipeline_mode = #tpu.pipeline_mode<synchronous>, transform_indices = @transform_5, window_bounds = array<i64: 128, 128>}, {pipeline_mode = #tpu.pipeline_mode<synchronous>, transform_indices = @transform_6, window_bounds = array<i64: 1, 128>}, {pipeline_mode = #tpu.pipeline_mode<synchronous>, transform_indices = @transform_7, window_bounds = array<i64: 1, 128>}, {pipeline_mode = #tpu.pipeline_mode<synchronous>, transform_indices = @transform_8, window_bounds = array<i64: 1, 128>}, {pipeline_mode = #tpu.pipeline_mode<synchronous>, transform_indices = @transform_9, window_bounds = array<i64: 128, 512>}, {pipeline_mode = #tpu.pipeline_mode<synchronous>, transform_indices = @transform_10, window_bounds = array<i64: 1, 512>}, {pipeline_mode = #tpu.pipeline_mode<synchronous>, transform_indices = @transform_11, window_bounds = array<i64: 512, 128>}, {pipeline_mode = #tpu.pipeline_mode<synchronous>, transform_indices = @transform_12, window_bounds = array<i64: 1, 128>}, {transform_indices = @transform_13, window_bounds = array<i64: 1, 16, 128>}]} {
    %c0 = arith.constant 0 : index
    %c0_0 = arith.constant 0 : index
    %c0_1 = arith.constant 0 : index
    %0 = vector.load %arg1[%c0, %c0_0, %c0_1] : memref<1x16x128xf32, #tpu.memory_space<vmem>>, vector<1x16x128xf32>
    %1 = vector.shape_cast %0 : vector<1x16x128xf32> to vector<16x128xf32>
    %c0_2 = arith.constant 0 : index
    %c0_3 = arith.constant 0 : index
    %2 = vector.load %arg2[%c0_2, %c0_3] : memref<1x128xf32, #tpu.memory_space<vmem>>, vector<1x128xf32>
    %c0_4 = arith.constant 0 : index
    %c0_5 = arith.constant 0 : index
    %3 = vector.load %arg3[%c0_4, %c0_5] : memref<1x128xf32, #tpu.memory_space<vmem>>, vector<1x128xf32>
    %cst = arith.constant dense<0.000000e+00> : vector<16xf32>
    %4 = vector.multi_reduction <add>, %1, %cst [1] : vector<16x128xf32> to vector<16xf32>
    %5 = vector.shape_cast %4 : vector<16xf32> to vector<16x1xf32>
    %cst_6 = arith.constant 1.280000e+02 : f32
    %6 = vector.broadcast %cst_6 : f32 to vector<16x1xf32>
    %7 = arith.divf %5, %6 : vector<16x1xf32>
    %8 = vector.broadcast %7 : vector<16x1xf32> to vector<16x128xf32>
    %9 = arith.subf %1, %8 : vector<16x128xf32>
    %10 = arith.mulf %9, %9 : vector<16x128xf32>
    %cst_7 = arith.constant dense<0.000000e+00> : vector<16xf32>
    %11 = vector.multi_reduction <add>, %10, %cst_7 [1] : vector<16x128xf32> to vector<16xf32>
    %12 = vector.shape_cast %11 : vector<16xf32> to vector<16x1xf32>
    %cst_8 = arith.constant 1.280000e+02 : f32
    %13 = vector.broadcast %cst_8 : f32 to vector<16x1xf32>
    %14 = arith.divf %12, %13 : vector<16x1xf32>
    %cst_9 = arith.constant 9.99999974E-6 : f32
    %15 = vector.broadcast %cst_9 : f32 to vector<16x1xf32>
    %16 = arith.addf %14, %15 : vector<16x1xf32>
    %17 = math.rsqrt %16 : vector<16x1xf32>
    %18 = vector.broadcast %17 : vector<16x1xf32> to vector<16x128xf32>
    %19 = arith.mulf %9, %18 : vector<16x128xf32>
    %20 = vector.broadcast %2 : vector<1x128xf32> to vector<16x128xf32>
    %21 = arith.mulf %19, %20 : vector<16x128xf32>
    %22 = vector.broadcast %3 : vector<1x128xf32> to vector<16x128xf32>
    %23 = arith.addf %21, %22 : vector<16x128xf32>
    %24 = arith.truncf %23 : vector<16x128xf32> to vector<16x128xbf16>
    %c0_10 = arith.constant 0 : index
    %c0_11 = arith.constant 0 : index
    %25 = vector.load %arg4[%c0_10, %c0_11] : memref<128x384xbf16, #tpu.memory_space<vmem>>, vector<128x384xbf16>
    %cst_12 = arith.constant dense<0.000000e+00> : vector<16x384xf32>
    %26 = tpu.matmul %24, %25, %cst_12 {dimension_numbers = #tpu.dot_dimension_numbers<[1], [0], [0], [1], [0, 0, 1, 1], [], []>} : vector<16x128xbf16>, vector<128x384xbf16>, vector<16x384xf32> -> vector<16x384xf32>
    %c0_13 = arith.constant 0 : index
    %c0_14 = arith.constant 0 : index
    %27 = vector.load %arg5[%c0_13, %c0_14] : memref<1x384xf32, #tpu.memory_space<vmem>>, vector<1x384xf32>
    %28 = vector.broadcast %27 : vector<1x384xf32> to vector<16x384xf32>
    %29 = arith.addf %26, %28 : vector<16x384xf32>
    %cst_15 = arith.constant 0.000000e+00 : f32
    %30 = vector.broadcast %cst_15 : f32 to vector<16x128xf32>
    %31 = vector.extract_strided_slice %29 {offsets = [0, 0], sizes = [16, 32], strides = [1, 1]} : vector<16x384xf32> to vector<16x32xf32>
    %32 = arith.truncf %31 : vector<16x32xf32> to vector<16x32xbf16>
    %33 = vector.extract_strided_slice %29 {offsets = [0, 128], sizes = [16, 32], strides = [1, 1]} : vector<16x384xf32> to vector<16x32xf32>
    %34 = arith.truncf %33 : vector<16x32xf32> to vector<16x32xbf16>
    %35 = vector.extract_strided_slice %29 {offsets = [0, 256], sizes = [16, 32], strides = [1, 1]} : vector<16x384xf32> to vector<16x32xf32>
    %36 = arith.truncf %35 : vector<16x32xf32> to vector<16x32xbf16>
    "tpu.trace_start"() <{level = 10 : i32, message = "qd,kd->qk"}> : () -> ()
    %cst_16 = arith.constant dense<0.000000e+00> : vector<16x16xf32>
    %37 = tpu.matmul %32, %34, %cst_16 {dimension_numbers = #tpu.dot_dimension_numbers<[1], [1], [0], [0], [0, 0, 1, 0], [], []>} : vector<16x32xbf16>, vector<16x32xbf16>, vector<16x16xf32> -> vector<16x16xf32>
    "tpu.trace_stop"() : () -> ()
    %cst_17 = arith.constant 0.176776692 : f32
    %38 = vector.broadcast %cst_17 : f32 to vector<16x16xf32>
    %39 = arith.mulf %37, %38 : vector<16x16xf32>
    %cst_18 = arith.constant dense<0xFF800000> : vector<16xf32>
    %40 = vector.multi_reduction <maximumf>, %39, %cst_18 [1] : vector<16x16xf32> to vector<16xf32>
    %41 = vector.shape_cast %40 : vector<16xf32> to vector<16x1xf32>
    %42 = vector.broadcast %41 : vector<16x1xf32> to vector<16x16xf32>
    %43 = arith.subf %39, %42 : vector<16x16xf32>
    %44 = math.exp %43 : vector<16x16xf32>
    %cst_19 = arith.constant dense<0.000000e+00> : vector<16xf32>
    %45 = vector.multi_reduction <add>, %44, %cst_19 [1] : vector<16x16xf32> to vector<16xf32>
    %46 = vector.shape_cast %45 : vector<16xf32> to vector<16x1xf32>
    %47 = vector.broadcast %46 : vector<16x1xf32> to vector<16x16xf32>
    %48 = arith.divf %44, %47 : vector<16x16xf32>
    %49 = arith.truncf %48 : vector<16x16xf32> to vector<16x16xbf16>
    %cst_20 = arith.constant dense<0.000000e+00> : vector<16x32xf32>
    %50 = tpu.matmul %49, %36, %cst_20 {dimension_numbers = #tpu.dot_dimension_numbers<[1], [0], [0], [1], [0, 0, 1, 1], [], []>} : vector<16x16xbf16>, vector<16x32xbf16>, vector<16x32xf32> -> vector<16x32xf32>
    %51 = arith.truncf %50 : vector<16x32xf32> to vector<16x32xbf16>
    %c0_21 = arith.constant 0 : index
    %c0_22 = arith.constant 0 : index
    %52 = vector.load %arg6[%c0_21, %c0_22] : memref<128x128xbf16, #tpu.memory_space<vmem>>, vector<32x128xbf16>
    %cst_23 = arith.constant dense<0.000000e+00> : vector<16x128xf32>
    %53 = tpu.matmul %51, %52, %cst_23 {dimension_numbers = #tpu.dot_dimension_numbers<[1], [0], [0], [1], [0, 0, 1, 1], [], []>} : vector<16x32xbf16>, vector<32x128xbf16>, vector<16x128xf32> -> vector<16x128xf32>
    %54 = arith.addf %30, %53 : vector<16x128xf32>
    %55 = vector.extract_strided_slice %29 {offsets = [0, 32], sizes = [16, 32], strides = [1, 1]} : vector<16x384xf32> to vector<16x32xf32>
    %56 = arith.truncf %55 : vector<16x32xf32> to vector<16x32xbf16>
    %57 = vector.extract_strided_slice %29 {offsets = [0, 160], sizes = [16, 32], strides = [1, 1]} : vector<16x384xf32> to vector<16x32xf32>
    %58 = arith.truncf %57 : vector<16x32xf32> to vector<16x32xbf16>
    %59 = vector.extract_strided_slice %29 {offsets = [0, 288], sizes = [16, 32], strides = [1, 1]} : vector<16x384xf32> to vector<16x32xf32>
    %60 = arith.truncf %59 : vector<16x32xf32> to vector<16x32xbf16>
    "tpu.trace_start"() <{level = 10 : i32, message = "qd,kd->qk"}> : () -> ()
    %cst_24 = arith.constant dense<0.000000e+00> : vector<16x16xf32>
    %61 = tpu.matmul %56, %58, %cst_24 {dimension_numbers = #tpu.dot_dimension_numbers<[1], [1], [0], [0], [0, 0, 1, 0], [], []>} : vector<16x32xbf16>, vector<16x32xbf16>, vector<16x16xf32> -> vector<16x16xf32>
    "tpu.trace_stop"() : () -> ()
    %cst_25 = arith.constant 0.176776692 : f32
    %62 = vector.broadcast %cst_25 : f32 to vector<16x16xf32>
    %63 = arith.mulf %61, %62 : vector<16x16xf32>
    %cst_26 = arith.constant dense<0xFF800000> : vector<16xf32>
    %64 = vector.multi_reduction <maximumf>, %63, %cst_26 [1] : vector<16x16xf32> to vector<16xf32>
    %65 = vector.shape_cast %64 : vector<16xf32> to vector<16x1xf32>
    %66 = vector.broadcast %65 : vector<16x1xf32> to vector<16x16xf32>
    %67 = arith.subf %63, %66 : vector<16x16xf32>
    %68 = math.exp %67 : vector<16x16xf32>
    %cst_27 = arith.constant dense<0.000000e+00> : vector<16xf32>
    %69 = vector.multi_reduction <add>, %68, %cst_27 [1] : vector<16x16xf32> to vector<16xf32>
    %70 = vector.shape_cast %69 : vector<16xf32> to vector<16x1xf32>
    %71 = vector.broadcast %70 : vector<16x1xf32> to vector<16x16xf32>
    %72 = arith.divf %68, %71 : vector<16x16xf32>
    %73 = arith.truncf %72 : vector<16x16xf32> to vector<16x16xbf16>
    %cst_28 = arith.constant dense<0.000000e+00> : vector<16x32xf32>
    %74 = tpu.matmul %73, %60, %cst_28 {dimension_numbers = #tpu.dot_dimension_numbers<[1], [0], [0], [1], [0, 0, 1, 1], [], []>} : vector<16x16xbf16>, vector<16x32xbf16>, vector<16x32xf32> -> vector<16x32xf32>
    %75 = arith.truncf %74 : vector<16x32xf32> to vector<16x32xbf16>
    %c32 = arith.constant 32 : index
    %c0_29 = arith.constant 0 : index
    %76 = vector.load %arg6[%c32, %c0_29] : memref<128x128xbf16, #tpu.memory_space<vmem>>, vector<32x128xbf16>
    %cst_30 = arith.constant dense<0.000000e+00> : vector<16x128xf32>
    %77 = tpu.matmul %75, %76, %cst_30 {dimension_numbers = #tpu.dot_dimension_numbers<[1], [0], [0], [1], [0, 0, 1, 1], [], []>} : vector<16x32xbf16>, vector<32x128xbf16>, vector<16x128xf32> -> vector<16x128xf32>
    %78 = arith.addf %54, %77 : vector<16x128xf32>
    %79 = vector.extract_strided_slice %29 {offsets = [0, 64], sizes = [16, 32], strides = [1, 1]} : vector<16x384xf32> to vector<16x32xf32>
    %80 = arith.truncf %79 : vector<16x32xf32> to vector<16x32xbf16>
    %81 = vector.extract_strided_slice %29 {offsets = [0, 192], sizes = [16, 32], strides = [1, 1]} : vector<16x384xf32> to vector<16x32xf32>
    %82 = arith.truncf %81 : vector<16x32xf32> to vector<16x32xbf16>
    %83 = vector.extract_strided_slice %29 {offsets = [0, 320], sizes = [16, 32], strides = [1, 1]} : vector<16x384xf32> to vector<16x32xf32>
    %84 = arith.truncf %83 : vector<16x32xf32> to vector<16x32xbf16>
    "tpu.trace_start"() <{level = 10 : i32, message = "qd,kd->qk"}> : () -> ()
    %cst_31 = arith.constant dense<0.000000e+00> : vector<16x16xf32>
    %85 = tpu.matmul %80, %82, %cst_31 {dimension_numbers = #tpu.dot_dimension_numbers<[1], [1], [0], [0], [0, 0, 1, 0], [], []>} : vector<16x32xbf16>, vector<16x32xbf16>, vector<16x16xf32> -> vector<16x16xf32>
    "tpu.trace_stop"() : () -> ()
    %cst_32 = arith.constant 0.176776692 : f32
    %86 = vector.broadcast %cst_32 : f32 to vector<16x16xf32>
    %87 = arith.mulf %85, %86 : vector<16x16xf32>
    %cst_33 = arith.constant dense<0xFF800000> : vector<16xf32>
    %88 = vector.multi_reduction <maximumf>, %87, %cst_33 [1] : vector<16x16xf32> to vector<16xf32>
    %89 = vector.shape_cast %88 : vector<16xf32> to vector<16x1xf32>
    %90 = vector.broadcast %89 : vector<16x1xf32> to vector<16x16xf32>
    %91 = arith.subf %87, %90 : vector<16x16xf32>
    %92 = math.exp %91 : vector<16x16xf32>
    %cst_34 = arith.constant dense<0.000000e+00> : vector<16xf32>
    %93 = vector.multi_reduction <add>, %92, %cst_34 [1] : vector<16x16xf32> to vector<16xf32>
    %94 = vector.shape_cast %93 : vector<16xf32> to vector<16x1xf32>
    %95 = vector.broadcast %94 : vector<16x1xf32> to vector<16x16xf32>
    %96 = arith.divf %92, %95 : vector<16x16xf32>
    %97 = arith.truncf %96 : vector<16x16xf32> to vector<16x16xbf16>
    %cst_35 = arith.constant dense<0.000000e+00> : vector<16x32xf32>
    %98 = tpu.matmul %97, %84, %cst_35 {dimension_numbers = #tpu.dot_dimension_numbers<[1], [0], [0], [1], [0, 0, 1, 1], [], []>} : vector<16x16xbf16>, vector<16x32xbf16>, vector<16x32xf32> -> vector<16x32xf32>
    %99 = arith.truncf %98 : vector<16x32xf32> to vector<16x32xbf16>
    %c64 = arith.constant 64 : index
    %c0_36 = arith.constant 0 : index
    %100 = vector.load %arg6[%c64, %c0_36] : memref<128x128xbf16, #tpu.memory_space<vmem>>, vector<32x128xbf16>
    %cst_37 = arith.constant dense<0.000000e+00> : vector<16x128xf32>
    %101 = tpu.matmul %99, %100, %cst_37 {dimension_numbers = #tpu.dot_dimension_numbers<[1], [0], [0], [1], [0, 0, 1, 1], [], []>} : vector<16x32xbf16>, vector<32x128xbf16>, vector<16x128xf32> -> vector<16x128xf32>
    %102 = arith.addf %78, %101 : vector<16x128xf32>
    %103 = vector.extract_strided_slice %29 {offsets = [0, 96], sizes = [16, 32], strides = [1, 1]} : vector<16x384xf32> to vector<16x32xf32>
    %104 = arith.truncf %103 : vector<16x32xf32> to vector<16x32xbf16>
    %105 = vector.extract_strided_slice %29 {offsets = [0, 224], sizes = [16, 32], strides = [1, 1]} : vector<16x384xf32> to vector<16x32xf32>
    %106 = arith.truncf %105 : vector<16x32xf32> to vector<16x32xbf16>
    %107 = vector.extract_strided_slice %29 {offsets = [0, 352], sizes = [16, 32], strides = [1, 1]} : vector<16x384xf32> to vector<16x32xf32>
    %108 = arith.truncf %107 : vector<16x32xf32> to vector<16x32xbf16>
    "tpu.trace_start"() <{level = 10 : i32, message = "qd,kd->qk"}> : () -> ()
    %cst_38 = arith.constant dense<0.000000e+00> : vector<16x16xf32>
    %109 = tpu.matmul %104, %106, %cst_38 {dimension_numbers = #tpu.dot_dimension_numbers<[1], [1], [0], [0], [0, 0, 1, 0], [], []>} : vector<16x32xbf16>, vector<16x32xbf16>, vector<16x16xf32> -> vector<16x16xf32>
    "tpu.trace_stop"() : () -> ()
    %cst_39 = arith.constant 0.176776692 : f32
    %110 = vector.broadcast %cst_39 : f32 to vector<16x16xf32>
    %111 = arith.mulf %109, %110 : vector<16x16xf32>
    %cst_40 = arith.constant dense<0xFF800000> : vector<16xf32>
    %112 = vector.multi_reduction <maximumf>, %111, %cst_40 [1] : vector<16x16xf32> to vector<16xf32>
    %113 = vector.shape_cast %112 : vector<16xf32> to vector<16x1xf32>
    %114 = vector.broadcast %113 : vector<16x1xf32> to vector<16x16xf32>
    %115 = arith.subf %111, %114 : vector<16x16xf32>
    %116 = math.exp %115 : vector<16x16xf32>
    %cst_41 = arith.constant dense<0.000000e+00> : vector<16xf32>
    %117 = vector.multi_reduction <add>, %116, %cst_41 [1] : vector<16x16xf32> to vector<16xf32>
    %118 = vector.shape_cast %117 : vector<16xf32> to vector<16x1xf32>
    %119 = vector.broadcast %118 : vector<16x1xf32> to vector<16x16xf32>
    %120 = arith.divf %116, %119 : vector<16x16xf32>
    %121 = arith.truncf %120 : vector<16x16xf32> to vector<16x16xbf16>
    %cst_42 = arith.constant dense<0.000000e+00> : vector<16x32xf32>
    %122 = tpu.matmul %121, %108, %cst_42 {dimension_numbers = #tpu.dot_dimension_numbers<[1], [0], [0], [1], [0, 0, 1, 1], [], []>} : vector<16x16xbf16>, vector<16x32xbf16>, vector<16x32xf32> -> vector<16x32xf32>
    %123 = arith.truncf %122 : vector<16x32xf32> to vector<16x32xbf16>
    %c96 = arith.constant 96 : index
    %c0_43 = arith.constant 0 : index
    %124 = vector.load %arg6[%c96, %c0_43] : memref<128x128xbf16, #tpu.memory_space<vmem>>, vector<32x128xbf16>
    %cst_44 = arith.constant dense<0.000000e+00> : vector<16x128xf32>
    %125 = tpu.matmul %123, %124, %cst_44 {dimension_numbers = #tpu.dot_dimension_numbers<[1], [0], [0], [1], [0, 0, 1, 1], [], []>} : vector<16x32xbf16>, vector<32x128xbf16>, vector<16x128xf32> -> vector<16x128xf32>
    %126 = arith.addf %102, %125 : vector<16x128xf32>
    %127 = arith.addf %1, %126 : vector<16x128xf32>
    %c0_45 = arith.constant 0 : index
    %c0_46 = arith.constant 0 : index
    %128 = vector.load %arg7[%c0_45, %c0_46] : memref<1x128xf32, #tpu.memory_space<vmem>>, vector<1x128xf32>
    %129 = vector.broadcast %128 : vector<1x128xf32> to vector<16x128xf32>
    %130 = arith.addf %127, %129 : vector<16x128xf32>
    %c0_47 = arith.constant 0 : index
    %c0_48 = arith.constant 0 : index
    %131 = vector.load %arg8[%c0_47, %c0_48] : memref<1x128xf32, #tpu.memory_space<vmem>>, vector<1x128xf32>
    %c0_49 = arith.constant 0 : index
    %c0_50 = arith.constant 0 : index
    %132 = vector.load %arg9[%c0_49, %c0_50] : memref<1x128xf32, #tpu.memory_space<vmem>>, vector<1x128xf32>
    %cst_51 = arith.constant dense<0.000000e+00> : vector<16xf32>
    %133 = vector.multi_reduction <add>, %130, %cst_51 [1] : vector<16x128xf32> to vector<16xf32>
    %134 = vector.shape_cast %133 : vector<16xf32> to vector<16x1xf32>
    %cst_52 = arith.constant 1.280000e+02 : f32
    %135 = vector.broadcast %cst_52 : f32 to vector<16x1xf32>
    %136 = arith.divf %134, %135 : vector<16x1xf32>
    %137 = vector.broadcast %136 : vector<16x1xf32> to vector<16x128xf32>
    %138 = arith.subf %130, %137 : vector<16x128xf32>
    %139 = arith.mulf %138, %138 : vector<16x128xf32>
    %cst_53 = arith.constant dense<0.000000e+00> : vector<16xf32>
    %140 = vector.multi_reduction <add>, %139, %cst_53 [1] : vector<16x128xf32> to vector<16xf32>
    %141 = vector.shape_cast %140 : vector<16xf32> to vector<16x1xf32>
    %cst_54 = arith.constant 1.280000e+02 : f32
    %142 = vector.broadcast %cst_54 : f32 to vector<16x1xf32>
    %143 = arith.divf %141, %142 : vector<16x1xf32>
    %cst_55 = arith.constant 9.99999974E-6 : f32
    %144 = vector.broadcast %cst_55 : f32 to vector<16x1xf32>
    %145 = arith.addf %143, %144 : vector<16x1xf32>
    %146 = math.rsqrt %145 : vector<16x1xf32>
    %147 = vector.broadcast %146 : vector<16x1xf32> to vector<16x128xf32>
    %148 = arith.mulf %138, %147 : vector<16x128xf32>
    %149 = vector.broadcast %131 : vector<1x128xf32> to vector<16x128xf32>
    %150 = arith.mulf %148, %149 : vector<16x128xf32>
    %151 = vector.broadcast %132 : vector<1x128xf32> to vector<16x128xf32>
    %152 = arith.addf %150, %151 : vector<16x128xf32>
    %153 = arith.truncf %152 : vector<16x128xf32> to vector<16x128xbf16>
    %c0_56 = arith.constant 0 : index
    %c0_57 = arith.constant 0 : index
    %154 = vector.load %arg10[%c0_56, %c0_57] : memref<128x512xbf16, #tpu.memory_space<vmem>>, vector<128x512xbf16>
    %cst_58 = arith.constant dense<0.000000e+00> : vector<16x512xf32>
    %155 = tpu.matmul %153, %154, %cst_58 {dimension_numbers = #tpu.dot_dimension_numbers<[1], [0], [0], [1], [0, 0, 1, 1], [], []>} : vector<16x128xbf16>, vector<128x512xbf16>, vector<16x512xf32> -> vector<16x512xf32>
    %c0_59 = arith.constant 0 : index
    %c0_60 = arith.constant 0 : index
    %156 = vector.load %arg11[%c0_59, %c0_60] : memref<1x512xf32, #tpu.memory_space<vmem>>, vector<1x512xf32>
    %157 = vector.broadcast %156 : vector<1x512xf32> to vector<16x512xf32>
    %158 = arith.addf %155, %157 : vector<16x512xf32>
    %159 = arith.mulf %158, %158 : vector<16x512xf32>
    %160 = arith.mulf %158, %159 : vector<16x512xf32>
    %cst_61 = arith.constant 4.471500e-02 : f32
    %161 = vector.broadcast %cst_61 : f32 to vector<16x512xf32>
    %162 = arith.mulf %161, %160 : vector<16x512xf32>
    %163 = arith.addf %158, %162 : vector<16x512xf32>
    %cst_62 = arith.constant 0.797884583 : f32
    %164 = vector.broadcast %cst_62 : f32 to vector<16x512xf32>
    %165 = arith.mulf %164, %163 : vector<16x512xf32>
    %166 = math.tanh %165 : vector<16x512xf32>
    %cst_63 = arith.constant 1.000000e+00 : f32
    %167 = vector.broadcast %cst_63 : f32 to vector<16x512xf32>
    %168 = arith.addf %167, %166 : vector<16x512xf32>
    %cst_64 = arith.constant 5.000000e-01 : f32
    %169 = vector.broadcast %cst_64 : f32 to vector<16x512xf32>
    %170 = arith.mulf %169, %168 : vector<16x512xf32>
    %171 = arith.mulf %158, %170 : vector<16x512xf32>
    %172 = arith.truncf %171 : vector<16x512xf32> to vector<16x512xbf16>
    %c0_65 = arith.constant 0 : index
    %c0_66 = arith.constant 0 : index
    %173 = vector.load %arg12[%c0_65, %c0_66] : memref<512x128xbf16, #tpu.memory_space<vmem>>, vector<512x128xbf16>
    %cst_67 = arith.constant dense<0.000000e+00> : vector<16x128xf32>
    %174 = tpu.matmul %172, %173, %cst_67 {dimension_numbers = #tpu.dot_dimension_numbers<[1], [0], [0], [1], [0, 0, 1, 1], [], []>} : vector<16x512xbf16>, vector<512x128xbf16>, vector<16x128xf32> -> vector<16x128xf32>
    %c0_68 = arith.constant 0 : index
    %c0_69 = arith.constant 0 : index
    %175 = vector.load %arg13[%c0_68, %c0_69] : memref<1x128xf32, #tpu.memory_space<vmem>>, vector<1x128xf32>
    %176 = vector.broadcast %175 : vector<1x128xf32> to vector<16x128xf32>
    %177 = arith.addf %174, %176 : vector<16x128xf32>
    %178 = arith.addf %130, %177 : vector<16x128xf32>
    %c0_70 = arith.constant 0 : index
    %c0_71 = arith.constant 0 : index
    %c0_72 = arith.constant 0 : index
    %179 = vector.load %arg14[%c0_70, %c0_71, %c0_72] : memref<1x16x128xf32, #tpu.memory_space<vmem>>, vector<1x16x128xf32>
    %180 = vector.shape_cast %179 : vector<1x16x128xf32> to vector<16x128xf32>
    %181 = vector.shape_cast %178 : vector<16x128xf32> to vector<1x16x128xf32>
    tpu.vector_store %arg14[%c0_70, %c0_71, %c0_72], %181 {strides = array<i32>} : memref<1x16x128xf32, #tpu.memory_space<vmem>>, vector<1x16x128xf32>,
    return
  }
  func.func @transform_0(%arg0: i32) -> (i32, i32, i32) {
    %c0_i32 = arith.constant 0 : i32
    %c0_i32_0 = arith.constant 0 : i32
    %c0_i32_1 = arith.constant 0 : i32
    return %arg0, %c0_i32, %c0_i32_0 : i32, i32, i32
  }
  func.func @transform_1(%arg0: i32) -> (i32, i32) {
    %c0_i32 = arith.constant 0 : i32
    %c0_i32_0 = arith.constant 0 : i32
    %c0_i32_1 = arith.constant 0 : i32
    return %c0_i32, %c0_i32_0 : i32, i32
  }
  func.func @transform_2(%arg0: i32) -> (i32, i32) {
    %c0_i32 = arith.constant 0 : i32
    %c0_i32_0 = arith.constant 0 : i32
    %c0_i32_1 = arith.constant 0 : i32
    return %c0_i32, %c0_i32_0 : i32, i32
  }
  func.func @transform_3(%arg0: i32) -> (i32, i32) {
    %c0_i32 = arith.constant 0 : i32
    %c0_i32_0 = arith.constant 0 : i32
    %c0_i32_1 = arith.constant 0 : i32
    return %c0_i32, %c0_i32_0 : i32, i32
  }
  func.func @transform_4(%arg0: i32) -> (i32, i32) {
    %c0_i32 = arith.constant 0 : i32
    %c0_i32_0 = arith.constant 0 : i32
    %c0_i32_1 = arith.constant 0 : i32
    return %c0_i32, %c0_i32_0 : i32, i32
  }
  func.func @transform_5(%arg0: i32) -> (i32, i32) {
    %c0_i32 = arith.constant 0 : i32
    %c0_i32_0 = arith.constant 0 : i32
    %c0_i32_1 = arith.constant 0 : i32
    return %c0_i32, %c0_i32_0 : i32, i32
  }
  func.func @transform_6(%arg0: i32) -> (i32, i32) {
    %c0_i32 = arith.constant 0 : i32
    %c0_i32_0 = arith.constant 0 : i32
    %c0_i32_1 = arith.constant 0 : i32
    return %c0_i32, %c0_i32_0 : i32, i32
  }
  func.func @transform_7(%arg0: i32) -> (i32, i32) {
    %c0_i32 = arith.constant 0 : i32
    %c0_i32_0 = arith.constant 0 : i32
    %c0_i32_1 = arith.constant 0 : i32
    return %c0_i32, %c0_i32_0 : i32, i32
  }
  func.func @transform_8(%arg0: i32) -> (i32, i32) {
    %c0_i32 = arith.constant 0 : i32
    %c0_i32_0 = arith.constant 0 : i32
    %c0_i32_1 = arith.constant 0 : i32
    return %c0_i32, %c0_i32_0 : i32, i32
  }
  func.func @transform_9(%arg0: i32) -> (i32, i32) {
    %c0_i32 = arith.constant 0 : i32
    %c0_i32_0 = arith.constant 0 : i32
    %c0_i32_1 = arith.constant 0 : i32
    return %c0_i32, %c0_i32_0 : i32, i32
  }
  func.func @transform_10(%arg0: i32) -> (i32, i32) {
    %c0_i32 = arith.constant 0 : i32
    %c0_i32_0 = arith.constant 0 : i32
    %c0_i32_1 = arith.constant 0 : i32
    return %c0_i32, %c0_i32_0 : i32, i32
  }
  func.func @transform_11(%arg0: i32) -> (i32, i32) {
    %c0_i32 = arith.constant 0 : i32
    %c0_i32_0 = arith.constant 0 : i32
    %c0_i32_1 = arith.constant 0 : i32
    return %c0_i32, %c0_i32_0 : i32, i32
  }
  func.func @transform_12(%arg0: i32) -> (i32, i32) {
    %c0_i32 = arith.constant 0 : i32
    %c0_i32_0 = arith.constant 0 : i32
    %c0_i32_1 = arith.constant 0 : i32
    return %c0_i32, %c0_i32_0 : i32, i32
  }
  func.func @transform_13(%arg0: i32) -> (i32, i32, i32) {
    %c0_i32 = arith.constant 0 : i32
    %c0_i32_0 = arith.constant 0 : i32
    %c0_i32_1 = arith.constant 0 : i32
    return %arg0, %c0_i32, %c0_i32_0 : i32, i32, i32
  }
}

</mosaic_0001>

<bundles_post_ra>
// kernel: tpu_custom_call.1
= control target key start
LH: loop header
LB: loop body
LE: loop exit
PB: predicated region body
PF: predicated region fallthrough
CT: control target
= control target key end

     0   :  { %s4580_s0 = inlined_call_operand.hbm [shape: f32[2,16,128], index: 0, kind: input, shape index: {}]   ;;  %s4581_s1 = inlined_call_operand.hbm [shape: f32[1,128], index: 1, kind: input, shape index: {}]   ;;  %s4582_s2 = inlined_call_operand.hbm [shape: f32[1,128], index: 2, kind: input, shape index: {}]   ;;  %s4583_s3 = inlined_call_operand.hbm [shape: bf16[128,384], index: 3, kind: input, shape index: {}]   ;;  %s4584_s4 = inlined_call_operand.hbm [shape: f32[1,384], index: 4, kind: input, shape index: {}]   ;;  %s4585_s5 = inlined_call_operand.hbm [shape: bf16[128,128], index: 5, kind: input, shape index: {}]   ;;  %s4586_s6 = inlined_call_operand.hbm [shape: f32[1,128], index: 6, kind: input, shape index: {}]   ;;  %s4587_s7 = inlined_call_operand.hbm [shape: f32[1,128], index: 7, kind: input, shape index: {}]   ;;  %s4588_s8 = inlined_call_operand.hbm [shape: f32[1,128], index: 8, kind: input, shape index: {}]   ;;  %s4589_s9 = inlined_call_operand.hbm [shape: bf16[128,512], index: 9, kind: input, shape index: {}]   ;;  %s4590_s10 = inlined_call_operand.hbm [shape: f32[1,512], index: 10, kind: input, shape index: {}]   ;;  %s4591_s11 = inlined_call_operand.hbm [shape: bf16[512,128], index: 11, kind: input, shape index: {}]   ;;  %s4592_s12 = inlined_call_operand.hbm [shape: f32[1,128], index: 12, kind: input, shape index: {}]   ;;  %s4593_s13 = inlined_call_operand.hbm [shape: f32[2,16,128], index: 13, kind: output, shape index: {}]  }
   0x1   :  { %4605 = sst [smem:[#allocation35_spill]] %s4580_s0 }
   0x2   :  { %4606 = sst [smem:[#allocation36_spill]] %s4581_s1 }
   0x3   :  { %4607 = sst [smem:[#allocation37_spill]] %s4583_s3 }
   0x4   :  { %4608 = sst [smem:[#allocation38_spill]] %s4593_s13 }
   0x5   :  { %18 = vsyncpa [#allocation3], 0 }
   0x6   :  { %20 = vsyncpa [#allocation3 + $0x1], 0 }
   0x7   :  { %21 = vsyncpa [#allocation6], 0 }
   0x8   :  { %22 = vsyncpa [#allocation9], 0 }
   0x9   :  { %23 = vsyncpa [#allocation12], 0 }
   0xa   :  { %24 = vsyncpa [#allocation15], 0 }
   0xb   :  { %25 = vsyncpa [#allocation18], 0 }
   0xc   :  { %26 = vsyncpa [#allocation21], 0 }
   0xd   :  { %27 = vsyncpa [#allocation4], 0 }
   0xe   :  { %29 = vsyncpa [#allocation4 + $0x1], 0  ;;  %s3896_s25 = smov 0   ;;  %s3898_s26 = smov 0  }
   0xf   :  { %s3900_s27 = smov 0   ;;  %s3902_s28 = smov 0  }
  0x10 LB: > { %4609 = sst [smem:[#allocation32_spill]] %s3782_s25  ;;  %s3796_s29 = smov [#allocation5]   ;;  %s3794_s28 = sphi %s3902_s28, %s4651_s28   ;;  %s3790_s27 = sphi %s3900_s27, %s4650_s27   ;;  %s3786_s26 = sphi %s3898_s26, %s4649_s26   ;;  %s3782_s25 = sphi %s3896_s25, %s4648_s25  }
  0x11   : > { %s357_s30 = sshll.u32 %s3796_s29, 4  ;;  %s3917_s14 = sadd.s32 4294967295, %s3794_s28   ;;  %s3922_s30 = int_to_ptr.vmem [resolvable:$true] %s357_s30 }
  0x12   : > { %4610 = sst [smem:[#allocation33_spill]] %s3917_s14  ;;  %p2643_p0 = scmp.ge.s32.totalorder %s3794_s28, 1 }
  0x13   : > { %p4600_p1 = scmp.eq.s32.totalorder %s3917_s14, 0  ;;  %p344_p2 = scmp.lt.s32.totalorder %s3794_s28, 3 }
  0x14   : > { %s3797_s16 = smov [#allocation8]   ;;  %s3798_s19 = smov [#allocation11]  }
  0x15   : > { %p3924_p3 = pnand %p2643_p0, %p344_p2  ;;  %s378_s17 = sshll.u32 %s3797_s16, 4  ;;  %s3931_s17 = int_to_ptr.vmem [resolvable:$true] %s378_s17 }
  0x16   : > { %s402_s20 = sshll.u32 %s3798_s19, 4  ;;  %s4614_s1 = sld [smem:[#allocation36_spill]]  ;;  %s3939_s20 = int_to_ptr.vmem [resolvable:$true] %s402_s20 }
  0x17   : > { %s4611_s15 = scalar_select %p3924_p3, 1, 0 }
  0x18   : > { %p3029_p5 = pneg %p3924_p3 }
  0x19   : > { %4612 = sst [smem:[#allocation34_spill]] %s4611_s15 }
  0x1a   : > { %p3935_p6 = pnand %p3029_p5, %p4600_p1 }
  0x1c   : > { %s3338_s23 = scalar_lea.hbm %s4614_s1, 16  ;;  %p3949_p8 = pneg %p3935_p6 }
  0x1d   : > { %p3339_p7 = scmp.ne.s32.totalorder %s4614_s1, %s3338_s23  ;;  %p3345_p11 = scmp.lt.u32.totalorder %s3338_s23, %s4614_s1 }
  0x1f   : > { %p3341_p9 = pnand %p3949_p8, %p3339_p7 }
  0x21   : > { %p3342_p10 = pneg %p3341_p9 }
  0x23   : > { %p3347_p12 = pnand %p3345_p11, %p3342_p10 }
  0x25   : > { %3350 = shalt.err (!%p3347_p12)
}
  0x26   : > { %s3351_s21 = scalar_lea.vmem %s3922_s30, 16  ;;  %s3358_s22 = scalar_lea.vmem %s3922_s30, 32 }
  0x27   : > { %p3352_p13 = scmp.ne.s32.totalorder %s3922_s30, %s3351_s21  ;;  %p3359_p5 = scmp.lt.s32.totalorder %s3922_s30, %s3922_s30 }
  0x28   : > { %p3360_p7 = scmp.lt.s32.totalorder %s3358_s22, %s3351_s21 }
  0x29   : > { %p3354_p0 = pnand %p3352_p13, %p3949_p8 }
  0x2a   : > { %p3361_p9 = por %p3360_p7, %p3359_p5 }
  0x2b   : > { %p3355_p2 = pneg %p3354_p0 }
  0x2d   : > { %p3362_p4 = pnand %p3361_p9, %p3355_p2 }
  0x2f   : > { %3365 = shalt.err (!%p3362_p4)
}
  0x30   : > { %3032 = dma.hbm_to_vmem [thread:$0]  (!%p3935_p6), %s4614_s1, 16, %s3922_s30, [#allocation6]  }
  0x31   : > { %s4616_s3 = sld [smem:[#allocation37_spill]] }
  0x37   : > { %s3366_s19 = scalar_lea.hbm %s4616_s3, 3072 }
  0x38   : > { %p3367_p10 = scmp.ne.s32.totalorder %s4616_s3, %s3366_s19  ;;  %p3373_p4 = scmp.lt.u32.totalorder %s3366_s19, %s4616_s3 }
  0x3a   : > { %p3369_p11 = pnand %p3367_p10, %p3949_p8 }
  0x3c   : > { %p3370_p12 = pneg %p3369_p11 }
  0x3e   : > { %p3375_p13 = pnand %p3373_p4, %p3370_p12 }
  0x40   : > { %3378 = shalt.err (!%p3375_p13)
}
  0x41   : > { %s3379_s30 = scalar_lea.vmem %s3931_s17, 3072  ;;  %p3387_p7 = scmp.lt.s32.totalorder %s3931_s17, %s3931_s17 }
  0x42   : > { %p3380_p0 = scmp.ne.s32.totalorder %s3931_s17, %s3379_s30  ;;  %p3388_p9 = scmp.lt.s32.totalorder %s3379_s30, %s3379_s30 }
  0x44   : > { %p3382_p2 = pnand %p3380_p0, %p3949_p8  ;;  %p3389_p10 = por %p3388_p9, %p3387_p7 }
  0x46   : > { %p3383_p5 = pneg %p3382_p2 }
  0x48   : > { %p3390_p11 = pnand %p3389_p10, %p3383_p5 }
  0x4a   : > { %3393 = shalt.err (!%p3390_p11)
}
  0x4b   : > { %s3799_s0 = smov 192   ;;  %s3800_s15 = smov 12  }
  0x4c   : > { %3038 = dma.hbm_to_vmem [thread:$0]  (!%p3935_p6), %s4616_s3, 3072, %s3931_s17, [#allocation9], %s3799_s0, %s3799_s0, %s3800_s15  }
  0x4d   : > { %s3394_s19 = scalar_lea.hbm %s4585_s5, 1024 }
  0x4e   : > { %p3395_p12 = scmp.ne.s32.totalorder %s4585_s5, %s3394_s19  ;;  %p3401_p0 = scmp.lt.u32.totalorder %s3394_s19, %s4585_s5 }
  0x50   : > { %p3397_p4 = pnand %p3395_p12, %p3949_p8 }
  0x52   : > { %p3398_p13 = pneg %p3397_p4 }
  0x54   : > { %p3403_p2 = pnand %p3401_p0, %p3398_p13 }
  0x56   : > { %3406 = shalt.err (!%p3403_p2)
}
  0x57   : > { %s3407_s17 = scalar_lea.vmem %s3939_s20, 1024  ;;  %p3415_p10 = scmp.lt.s32.totalorder %s3939_s20, %s3939_s20 }
  0x58   : > { %p3408_p5 = scmp.ne.s32.totalorder %s3939_s20, %s3407_s17  ;;  %p3416_p11 = scmp.lt.s32.totalorder %s3407_s17, %s3407_s17 }
  0x5a   : > { %p3410_p7 = pnand %p3408_p5, %p3949_p8  ;;  %p3417_p12 = por %p3416_p11, %p3415_p10 }
  0x5c   : > { %p3411_p9 = pneg %p3410_p7 }
  0x5e   : > { %p3418_p4 = pnand %p3417_p12, %p3411_p9 }
  0x60   : > { %3421 = shalt.err (!%p3418_p4)
}
  0x61   : > { %s4602_s0 = smov 64   ;;  %s4603_s1 = smov 4  }
  0x62   : > { %3044 = dma.hbm_to_vmem [thread:$0]  (!%p3935_p6), %s4585_s5, 1024, %s3939_s20, [#allocation12], %s4602_s0, %s4602_s0, %s4603_s1  }
  0x63   : > { %s3803_s23 = smov [#allocation14]   ;;  %s3804_s29 = smov [#allocation17]  }
  0x64   : > { %s427_s24 = sshll.u32 %s3803_s23, 4  ;;  %s448_s19 = sshll.u32 %s3804_s29, 4  ;;  %s428_s24 = int_to_ptr.vmem [resolvable:$true] %s427_s24  ;;  %s449_s19 = int_to_ptr.vmem [resolvable:$true] %s448_s19 }
  0x65   : > { %s3422_s30 = scalar_lea.hbm %s4587_s7, 16 }
  0x66   : > { %p3423_p13 = scmp.ne.s32.totalorder %s4587_s7, %s3422_s30  ;;  %p3429_p5 = scmp.lt.u32.totalorder %s3422_s30, %s4587_s7 }
  0x68   : > { %p3425_p0 = pnand %p3423_p13, %p3949_p8 }
  0x6a   : > { %p3426_p2 = pneg %p3425_p0 }
  0x6c   : > { %p3431_p7 = pnand %p3429_p5, %p3426_p2 }
  0x6e   : > { %3434 = shalt.err (!%p3431_p7)
}
  0x6f   : > { %s3435_s20 = scalar_lea.vmem %s428_s24, 16  ;;  %s3442_s15 = scalar_lea.vmem %s428_s24, 32 }
  0x70   : > { %p3436_p9 = scmp.ne.s32.totalorder %s428_s24, %s3435_s20  ;;  %p3443_p12 = scmp.lt.s32.totalorder %s428_s24, %s428_s24 }
  0x71   : > { %p3444_p4 = scmp.lt.s32.totalorder %s3442_s15, %s3435_s20 }
  0x72   : > { %p3438_p10 = pnand %p3436_p9, %p3949_p8 }
  0x73   : > { %p3445_p1 = por %p3444_p4, %p3443_p12 }
  0x74   : > { %p3439_p11 = pneg %p3438_p10 }
  0x76   : > { %p3446_p3 = pnand %p3445_p1, %p3439_p11 }
  0x78   : > { %3449 = shalt.err (!%p3446_p3)
}
  0x79   : > { %3050 = dma.hbm_to_vmem [thread:$0]  (!%p3935_p6), %s4587_s7, 16, %s428_s24, [#allocation15]  }
  0x7a   : > { %s3450_s23 = scalar_lea.hbm %s4589_s9, 4096 }
  0x7b   : > { %p3451_p13 = scmp.ne.s32.totalorder %s4589_s9, %s3450_s23  ;;  %p3457_p3 = scmp.lt.u32.totalorder %s3450_s23, %s4589_s9 }
  0x7d   : > { %p3453_p0 = pnand %p3451_p13, %p3949_p8 }
  0x7f   : > { %p3454_p1 = pneg %p3453_p0 }
  0x81   : > { %p3459_p2 = pnand %p3457_p3, %p3454_p1 }
  0x83   : > { %3462 = shalt.err (!%p3459_p2)
}
  0x84   : > { %s3463_s17 = scalar_lea.vmem %s449_s19, 4096  ;;  %p3471_p10 = scmp.lt.s32.totalorder %s449_s19, %s449_s19 }
  0x85   : > { %p3464_p5 = scmp.ne.s32.totalorder %s449_s19, %s3463_s17  ;;  %p3472_p11 = scmp.lt.s32.totalorder %s3463_s17, %s3463_s17 }
  0x87   : > { %p3466_p7 = pnand %p3464_p5, %p3949_p8  ;;  %p3473_p12 = por %p3472_p11, %p3471_p10 }
  0x89   : > { %p3467_p9 = pneg %p3466_p7 }
  0x8b   : > { %p3474_p4 = pnand %p3473_p12, %p3467_p9 }
  0x8d   : > { %3477 = shalt.err (!%p3474_p4)
}
  0x8e   : > { %s3805_s24 = smov 256   ;;  %s3806_s20 = smov 16  }
  0x8f   : > { %3056 = dma.hbm_to_vmem [thread:$0]  (!%p3935_p6), %s4589_s9, 4096, %s449_s19, [#allocation18], %s3805_s24, %s3805_s24, %s3806_s20  }
  0x90   : > { %s3807_s13 = smov [#allocation20]   ;;  %s3808_s14 = smov [#allocation7]  }
  0x91   : > { %s472_s25 = sshll.u32 %s3807_s13, 4  ;;  %s368_s23 = sshll.u32 %s3808_s14, 4  ;;  %s473_s25 = int_to_ptr.vmem [resolvable:$true] %s472_s25  ;;  %s369_s23 = int_to_ptr.vmem [resolvable:$true] %s368_s23 }
  0x92   : > { %s3478_s22 = scalar_lea.hbm %s4591_s11, 4096 }
  0x93   : > { %p3479_p13 = scmp.ne.s32.totalorder %s4591_s11, %s3478_s22  ;;  %p3485_p3 = scmp.lt.u32.totalorder %s3478_s22, %s4591_s11 }
  0x95   : > { %p3481_p0 = pnand %p3479_p13, %p3949_p8 }
  0x97   : > { %p3482_p1 = pneg %p3481_p0 }
  0x99   : > { %p3487_p2 = pnand %p3485_p3, %p3482_p1 }
  0x9b   : > { %3490 = shalt.err (!%p3487_p2)
}
  0x9c   : > { %s3491_s19 = scalar_lea.vmem %s473_s25, 4096  ;;  %p3499_p10 = scmp.lt.s32.totalorder %s473_s25, %s473_s25 }
  0x9d   : > { %p3492_p5 = scmp.ne.s32.totalorder %s473_s25, %s3491_s19  ;;  %p3500_p11 = scmp.lt.s32.totalorder %s3491_s19, %s3491_s19 }
  0x9f   : > { %p3494_p7 = pnand %p3492_p5, %p3949_p8  ;;  %p3501_p12 = por %p3500_p11, %p3499_p10 }
  0xa1   : > { %p3495_p9 = pneg %p3494_p7 }
  0xa3   : > { %p3502_p4 = pnand %p3501_p12, %p3495_p9 }
  0xa5   : > { %3505 = shalt.err (!%p3502_p4)
}
  0xa6   : > { %s4617_s24 = smov 4   ;;  %s4618_s20 = smov 64  }
  0xa7   : > { %3062 = dma.hbm_to_vmem [thread:$0]  (!%p3935_p6), %s4591_s11, 4096, %s473_s25, [#allocation21], %s4618_s20, %s4618_s20, %s4617_s24  }
  0xa8   : > { %s3506_s13 = scalar_lea.hbm %s4582_s2, 16 }
  0xa9   : > { %p3507_p13 = scmp.ne.s32.totalorder %s4582_s2, %s3506_s13  ;;  %p3513_p3 = scmp.lt.u32.totalorder %s3506_s13, %s4582_s2 }
  0xab   : > { %p3509_p0 = pnand %p3507_p13, %p3949_p8 }
  0xad   : > { %p3510_p1 = pneg %p3509_p0 }
  0xaf   : > { %p3515_p2 = pnand %p3513_p3, %p3510_p1 }
  0xb1   : > { %3518 = shalt.err (!%p3515_p2)
}
  0xb2   : > { %s3519_s30 = scalar_lea.vmem %s369_s23, 16  ;;  %s3526_s25 = scalar_lea.vmem %s369_s23, 32 }
  0xb3   : > { %p3520_p5 = scmp.ne.s32.totalorder %s369_s23, %s3519_s30  ;;  %p3527_p10 = scmp.lt.s32.totalorder %s369_s23, %s369_s23 }
  0xb4   : > { %p3528_p11 = scmp.lt.s32.totalorder %s3526_s25, %s3519_s30 }
  0xb5   : > { %p3522_p7 = pnand %p3520_p5, %p3949_p8 }
  0xb6   : > { %p3529_p12 = por %p3528_p11, %p3527_p10 }
  0xb7   : > { %p3523_p9 = pneg %p3522_p7 }
  0xb9   : > { %p3530_p4 = pnand %p3529_p12, %p3523_p9 }
  0xbb   : > { %3533 = shalt.err (!%p3530_p4)
}
  0xbc   : > { %3035 = dma.hbm_to_vmem [thread:$0]  (!%p3935_p6), %s4582_s2, 16, %s369_s23, [#allocation6]  }
  0xbd   : > { %s3809_s24 = smov [#allocation10]   ;;  %s3810_s0 = smov [#allocation13]  }
  0xbe   : > { %s392_s20 = sshll.u32 %s3809_s24, 4  ;;  %s416_s1 = sshll.u32 %s3810_s0, 4  ;;  %s393_s20 = int_to_ptr.vmem [resolvable:$true] %s392_s20  ;;  %s417_s1 = int_to_ptr.vmem [resolvable:$true] %s416_s1 }
  0xbf   : > { %s3534_s13 = scalar_lea.hbm %s4584_s4, 48 }
  0xc0   : > { %p3535_p13 = scmp.ne.s32.totalorder %s4584_s4, %s3534_s13  ;;  %p3541_p3 = scmp.lt.u32.totalorder %s3534_s13, %s4584_s4 }
  0xc2   : > { %p3537_p0 = pnand %p3535_p13, %p3949_p8 }
  0xc4   : > { %p3538_p1 = pneg %p3537_p0 }
  0xc6   : > { %p3543_p2 = pnand %p3541_p3, %p3538_p1 }
  0xc8   : > { %3546 = shalt.err (!%p3543_p2)
}
  0xc9   : > { %s3547_s23 = scalar_lea.vmem %s393_s20, 48  ;;  %s3554_s30 = scalar_lea.vmem %s393_s20, 64 }
  0xca   : > { %p3548_p5 = scmp.ne.s32.totalorder %s393_s20, %s3547_s23  ;;  %p3555_p10 = scmp.lt.s32.totalorder %s393_s20, %s393_s20 }
  0xcb   : > { %p3556_p11 = scmp.lt.s32.totalorder %s3554_s30, %s3547_s23 }
  0xcc   : > { %p3550_p7 = pnand %p3548_p5, %p3949_p8 }
  0xcd   : > { %p3557_p12 = por %p3556_p11, %p3555_p10 }
  0xce   : > { %p3551_p9 = pneg %p3550_p7 }
  0xd0   : > { %p3558_p4 = pnand %p3557_p12, %p3551_p9 }
  0xd2   : > { %3561 = shalt.err (!%p3558_p4)
}
  0xd3   : > { %3041 = dma.hbm_to_vmem [thread:$0]  (!%p3935_p6), %s4584_s4, 48, %s393_s20, [#allocation9]  }
  0xd4   : > { %s3562_s0 = scalar_lea.hbm %s4586_s6, 16 }
  0xd5   : > { %p3563_p13 = scmp.ne.s32.totalorder %s4586_s6, %s3562_s0  ;;  %p3569_p3 = scmp.lt.u32.totalorder %s3562_s0, %s4586_s6 }
  0xd7   : > { %p3565_p0 = pnand %p3563_p13, %p3949_p8 }
  0xd9   : > { %p3566_p1 = pneg %p3565_p0 }
  0xdb   : > { %p3571_p2 = pnand %p3569_p3, %p3566_p1 }
  0xdd   : > { %3574 = shalt.err (!%p3571_p2)
}
  0xde   : > { %s3575_s29 = scalar_lea.vmem %s417_s1, 16  ;;  %s3582_s20 = scalar_lea.vmem %s417_s1, 32 }
  0xdf   : > { %p3576_p5 = scmp.ne.s32.totalorder %s417_s1, %s3575_s29  ;;  %p3583_p10 = scmp.lt.s32.totalorder %s417_s1, %s417_s1 }
  0xe0   : > { %p3584_p11 = scmp.lt.s32.totalorder %s3582_s20, %s3575_s29 }
  0xe1   : > { %p3578_p7 = pnand %p3576_p5, %p3949_p8 }
  0xe2   : > { %p3585_p12 = por %p3584_p11, %p3583_p10 }
  0xe3   : > { %p3579_p9 = pneg %p3578_p7 }
  0xe5   : > { %p3586_p4 = pnand %p3585_p12, %p3579_p9 }
  0xe7   : > { %3589 = shalt.err (!%p3586_p4)
}
  0xe8   : > { %3047 = dma.hbm_to_vmem [thread:$0]  (!%p3935_p6), %s4586_s6, 16, %s417_s1, [#allocation12]  }
  0xe9   : > { %s3811_s23 = smov [#allocation16]   ;;  %s3812_s25 = smov [#allocation19]  }
  0xea   : > { %s438_s30 = sshll.u32 %s3811_s23, 4  ;;  %s462_s17 = sshll.u32 %s3812_s25, 4  ;;  %s439_s30 = int_to_ptr.vmem [resolvable:$true] %s438_s30  ;;  %s463_s17 = int_to_ptr.vmem [resolvable:$true] %s462_s17 }
  0xeb   : > { %s3590_s0 = scalar_lea.hbm %s4588_s8, 16 }
  0xec   : > { %p3591_p13 = scmp.ne.s32.totalorder %s4588_s8, %s3590_s0  ;;  %p3597_p3 = scmp.lt.u32.totalorder %s3590_s0, %s4588_s8 }
  0xee   : > { %p3593_p0 = pnand %p3591_p13, %p3949_p8 }
  0xf0   : > { %p3594_p1 = pneg %p3593_p0 }
  0xf2   : > { %p3599_p2 = pnand %p3597_p3, %p3594_p1 }
  0xf4   : > { %3602 = shalt.err (!%p3599_p2)
}
  0xf5   : > { %s3603_s1 = scalar_lea.vmem %s439_s30, 16  ;;  %s3610_s29 = scalar_lea.vmem %s439_s30, 32 }
  0xf6   : > { %p3604_p5 = scmp.ne.s32.totalorder %s439_s30, %s3603_s1  ;;  %p3611_p10 = scmp.lt.s32.totalorder %s439_s30, %s439_s30 }
  0xf7   : > { %p3612_p11 = scmp.lt.s32.totalorder %s3610_s29, %s3603_s1 }
  0xf8   : > { %p3606_p7 = pnand %p3604_p5, %p3949_p8 }
  0xf9   : > { %p3613_p12 = por %p3612_p11, %p3611_p10 }
  0xfa   : > { %p3607_p9 = pneg %p3606_p7 }
  0xfc   : > { %p3614_p4 = pnand %p3613_p12, %p3607_p9 }
  0xfe   : > { %3617 = shalt.err (!%p3614_p4)
}
  0xff   : > { %3053 = dma.hbm_to_vmem [thread:$0]  (!%p3935_p6), %s4588_s8, 16, %s439_s30, [#allocation15]  }
 0x100   : > { %s3618_s25 = scalar_lea.hbm %s4590_s10, 64 }
 0x101   : > { %p3619_p13 = scmp.ne.s32.totalorder %s4590_s10, %s3618_s25  ;;  %p3625_p3 = scmp.lt.u32.totalorder %s3618_s25, %s4590_s10 }
 0x103   : > { %p3621_p0 = pnand %p3619_p13, %p3949_p8 }
 0x105   : > { %p3622_p1 = pneg %p3621_p0 }
 0x107   : > { %p3627_p2 = pnand %p3625_p3, %p3622_p1 }
 0x109   : > { %3630 = shalt.err (!%p3627_p2)
}
 0x10a   : > { %s3631_s3 = scalar_lea.vmem %s463_s17, 64  ;;  %p3639_p10 = scmp.lt.s32.totalorder %s463_s17, %s463_s17 }
 0x10b   : > { %p3632_p5 = scmp.ne.s32.totalorder %s463_s17, %s3631_s3  ;;  %p3640_p11 = scmp.lt.s32.totalorder %s3631_s3, %s3631_s3 }
 0x10d   : > { %p3634_p7 = pnand %p3632_p5, %p3949_p8  ;;  %p3641_p12 = por %p3640_p11, %p3639_p10 }
 0x10f   : > { %p3635_p9 = pneg %p3634_p7 }
 0x111   : > { %p3642_p4 = pnand %p3641_p12, %p3635_p9 }
 0x113   : > { %3645 = shalt.err (!%p3642_p4)
}
 0x114   : > { %3059 = dma.hbm_to_vmem [thread:$0]  (!%p3935_p6), %s4590_s10, 64, %s463_s17, [#allocation18]  }
 0x115   : > { %s3813_s14 = smov [#allocation22]   ;;  %s3646_s21 = scalar_lea.hbm %s4592_s12, 16 }
 0x116   : > { %s486_s1 = sshll.u32 %s3813_s14, 4  ;;  %p3647_p13 = scmp.ne.s32.totalorder %s4592_s12, %s3646_s21  ;;  %s487_s1 = int_to_ptr.vmem [resolvable:$true] %s486_s1 }
 0x117   : > { %p3653_p3 = scmp.lt.u32.totalorder %s3646_s21, %s4592_s12 }
 0x118   : > { %p3649_p0 = pnand %p3647_p13, %p3949_p8 }
 0x11a   : > { %p3650_p1 = pneg %p3649_p0 }
 0x11c   : > { %p3655_p2 = pnand %p3653_p3, %p3650_p1 }
 0x11e   : > { %3658 = shalt.err (!%p3655_p2)
}
 0x11f   : > { %s3659_s17 = scalar_lea.vmem %s487_s1, 16  ;;  %s3666_s24 = scalar_lea.vmem %s487_s1, 32 }
 0x120   : > { %p3660_p5 = scmp.ne.s32.totalorder %s487_s1, %s3659_s17  ;;  %p3667_p10 = scmp.lt.s32.totalorder %s487_s1, %s487_s1 }
 0x121   : > { %p3668_p11 = scmp.lt.s32.totalorder %s3666_s24, %s3659_s17 }
 0x122   : > { %p3662_p7 = pnand %p3660_p5, %p3949_p8 }
 0x123   : > { %p3669_p12 = por %p3668_p11, %p3667_p10 }
 0x124   : > { %p3663_p9 = pneg %p3662_p7 }
 0x126   : > { %p3670_p4 = pnand %p3669_p12, %p3663_p9 }
 0x128   : > { %3673 = shalt.err (!%p3670_p4)
}
 0x129   : > { %s4619_s16 = sld [smem:[#allocation32_spill]]  ;;  %s4620_s3 = sld [smem:[#allocation33_spill]] }
 0x12a   : > { %3065 = dma.hbm_to_vmem [thread:$0]  (!%p3935_p6), %s4592_s12, 16, %s487_s1, [#allocation21]  }
 0x12b   : > { %s2642_s30 = sadd.s32 4294967294, %s3794_s28   ;;  %s4187_s18 = sadd.s32 1, %s3794_s28  }
 0x12c   : > { %s39_s13 = ssub.s32 %s3794_s28, %s4187_s18  ;;  %s42_s14 = sadd.s32 1, %s3790_s27 }
 0x12d   : > { %p40_p8 = scmp.eq.s32.totalorder %s39_s13, 0  ;;  %p49_p13 = scmp.ne.s32.totalorder %s3790_s27, %s3786_s26 }
 0x12e   : > { %p50_p0 = scmp.eq.s32.totalorder %s3794_s28, 0  ;;  %p337_p7 = scmp.eq.s32.totalorder %s2642_s30, 1 }
 0x12f   : > { %p55_p1 = scmp.ne.s32.totalorder %s3786_s26, %s4619_s16  ;;  %p4622_p2 = scmp.eq.s32.totalorder %s4620_s3, 0 }
 0x130   : > { %s4198_s29 = scalar_select %p40_p8, %s3790_s27, %s42_s14  }
 0x131   : > { %p4200_p3 = por %p50_p0, %p49_p13  ;;  %p4206_p6 = por %p4622_p2, %p55_p1 }
 0x132   : > { %p331_p5 = scmp.eq.s32.totalorder %s4620_s3, 1  ;;  %p3086_p9 = scmp.lt.s32.totalorder %s3794_s28, 2 }
 0x133   : > { %s497_s21 = sand.u32 1, %s3790_s27   ;;  %p4217_p11 = por %p337_p7, %p55_p1 }
 0x134   : > { %p4213_p10 = por %p331_p5, %p49_p13  ;;  %s2657_s25 = sshll.u32 %s497_s21, 4 }
 0x135   : > { %s4625_s23 = scalar_select %p4217_p11, 1, 0 }
 0x136   : > { %s4624_s22 = scalar_select %p4213_p10, 1, 0 }
 0x137   : > { %s2794_s19 = sshll.u32 %s3794_s28, 8  ;;  %s4626_s0 = sld [smem:[#allocation35_spill]] }
 0x138   : > { %s501_s16 = scalar_lea.vmem [#allocation2], %s2657_s25  ;;  %p4231_p12 = pnand %p3086_p9, %p4200_p3 }
 0x139   : > { %s508_s3 = sshll.u32 %s501_s16, 4  ;;  %s4235_s13 = scalar_lea.sflag [#allocation3], %s497_s21  ;;  %s4227_s3 = int_to_ptr.vmem [resolvable:$true] %s508_s3 }
 0x13a   : > { %p3676_p8 = pneg %p4231_p12 }
 0x13d   : > { %s4225_s15 = scalar_lea.hbm %s4626_s0, %s2794_s19  ;;  %s3679_s20 = scalar_lea.hbm %s4626_s0, 512 }
 0x13e   : > { %s3674_s14 = scalar_lea.hbm %s4225_s15, 256  ;;  %p3680_p1 = scmp.lt.u32.totalorder %s4225_s15, %s4626_s0 }
 0x13f   : > { %p3675_p4 = scmp.ne.s32.totalorder %s4225_s15, %s3674_s14  ;;  %p3681_p3 = scmp.lt.u32.totalorder %s3679_s20, %s3674_s14 }
 0x140   : > { %p3683_p5 = scmp.lt.u32.totalorder %s3674_s14, %s4225_s15 }
 0x141   : > { %p3677_p13 = pnand %p3676_p8, %p3675_p4  ;;  %p3682_p2 = por %p3681_p3, %p3680_p1 }
 0x143   : > { %p3678_p0 = pneg %p3677_p13  ;;  %p3684_p7 = por %p3683_p5, %p3682_p2 }
 0x145   : > { %p3685_p9 = pnand %p3684_p7, %p3678_p0 }
 0x147   : > { %3688 = shalt.err (!%p3685_p9)
}
 0x148   : > { %s3689_s21 = scalar_lea.vmem %s4227_s3, 256  ;;  %s3814_s16 = smov [#allocation2]  }
 0x149   : > { %p3690_p4 = scmp.ne.s32.totalorder %s4227_s3, %s3689_s21  ;;  %s3694_s25 = sshll.u32 %s3814_s16, 4  ;;  %s3695_s25 = int_to_ptr.vmem [resolvable:$false] %s3694_s25 }
 0x14a   : > { %s3696_s19 = scalar_lea.vmem %s3695_s25, 512  ;;  %p3697_p10 = scmp.lt.s32.totalorder %s4227_s3, %s3695_s25 }
 0x14b   : > { %p3692_p13 = pnand %p3690_p4, %p3676_p8  ;;  %p3698_p1 = scmp.lt.s32.totalorder %s3696_s19, %s3689_s21 }
 0x14d   : > { %p3693_p11 = pneg %p3692_p13  ;;  %p3699_p3 = por %p3698_p1, %p3697_p10 }
 0x14f   : > { %p3700_p2 = pnand %p3699_p3, %p3693_p11 }
 0x151   : > { %3703 = shalt.err (!%p3700_p2)
}
 0x152   : > { %s3815_s14 = smov 128   ;;  %s3816_s20 = smov 8  }
 0x153   : > { %3069 = dma.hbm_to_vmem [thread:$0]  (!%p4231_p12), %s4225_s15, 256, %s4227_s3, %s4235_s13, %s3815_s14, %s3815_s14, %s3816_s20  }
 0x154   : > { %s4628_s17 = sld [smem:[#allocation34_spill]] }
 0x15a   : > { %p4629_p8 = scmp.ne.s32.totalorder %s4628_s17, 0 }
 0x15b   : > { %s4266_s24 = sand.u32 (!%p4629_p8), 1, %s3786_s26  }
 0x15c   : > { %520 = sbr.rel (%p4629_p8) target bundleno = 4110 (0x100e), region = 72  ;;  %s2661_s21 = sshll.u32 (!%p4629_p8), %s4266_s24, 4 }
 0x15d   : > { %s523_s16 = scalar_lea.sflag (!%p4629_p8), [#allocation3], %s4266_s24  ;;  %s4272_s25 = scalar_lea.vmem (!%p4629_p8), [#allocation2], %s2661_s21 }
 0x163   : > { %3749 = dma.done.wait (%p4206_p6), %s523_s16, 256  }
 0x164   : > { %3751 = vsyncadd (%p4206_p6), %s523_s16, 4294967040  ;;  %s4630_s15 = sld [smem:[#allocation33_spill]] }
 0x16a   : > { %p4631_p10 = scmp.eq.s32.totalorder %s4630_s15, 0 }
 0x16c   : > { %3753 = dma.done.wait (%p4631_p10), [#allocation6], 32   ;;  %p4632_p11 = pmov %p4631_p10 }
 0x16d   : > { %p4633_p12 = pmov %p4631_p10 }
 0x16e   : > { %3755 = vsyncadd (%p4632_p11), [#allocation6], 4294967264 }
 0x16f   : > { %3757 = dma.done.wait (%p4633_p12), [#allocation9], 3120   ;;  %p4634_p0 = pmov %p4631_p10 }
 0x171   : > { %3759 = vsyncadd (%p4634_p0), [#allocation9], 4294964176  ;;  %p4635_p5 = pmov %p4634_p0 }
 0x172   : > { %p4636_p7 = pmov %p4634_p0 }
 0x173   : > { %3761 = dma.done.wait (%p4635_p5), [#allocation12], 1040  }
 0x174   : > { %3763 = vsyncadd (%p4636_p7), [#allocation12], 4294966256  ;;  %p4637_p6 = pmov %p4634_p0 }
 0x175   : > { %p4638_p9 = pmov %p4634_p0 }
 0x176   : > { %3765 = dma.done.wait (%p4637_p6), [#allocation15], 32  }
 0x177   : > { %3767 = vsyncadd (%p4638_p9), [#allocation15], 4294967264  ;;  %p4639_p4 = pmov %p4634_p0 }
 0x178   : > { %p4640_p13 = pmov %p4634_p0 }
 0x179   : > { %3769 = dma.done.wait (%p4639_p4), [#allocation18], 4160  }
 0x17a   : > { %3771 = vsyncadd (%p4640_p13), [#allocation18], 4294963136  ;;  %p4641_p1 = pmov %p4634_p0 }
 0x17b   : > { %p4642_p3 = pmov %p4634_p0 }
 0x17c   : > { %3773 = dma.done.wait (%p4641_p1), [#allocation21], 4112  }
 0x17d   : > { %3775 = vsyncadd (%p4642_p3), [#allocation21], 4294963184  ;;  %v618_v0 = vld [vmem:[%s4272_s25] sm:$0xff]  ;;  %v619_v1 = vld [vmem:[%s4272_s25 + $0x8] sm:$0xff]  ;;  %v3817_v4 = vmov 0.0   ;;  %v3818_v30 = vmov 0   ;;  %v696_v53 = vlaneseq }
 0x17e   : > { %622 = vadd.xlane.f32.xlu0 %v618_v0  ;;  %v3160_v2 = vld [vmem:[#allocation8 + $0x4] ss:$12 sps:$4 sm:$0xff]   ;;  %v3162_v3 = vld [vmem:[#allocation8] ss:$12 sps:$4 sm:$0xff]   ;;  %2877 = vmatprep.subr.bf16.mxu1 %v3817_v4  ;;  %v3163_v5 = vld [vmem:[#allocation8 + $0x8] ss:$12 sps:$4 sm:$0xff]  }
 0x17f   : > { %v3164_v6 = vld [vmem:[#allocation8 + $0x1c] ss:$12 sps:$4 sm:$0xff]   ;;  %839 = vmatprep.subr.bf16.mxu0 %v3160_v2  ;;  %2878 = vmatpush3.bf16.msra.mxu1 %v3163_v5  ;;  %v3166_v15 = vld [vmem:[#allocation8 + $0x18] ss:$12 sps:$4 sm:$0xff]   ;;  %v3167_v16 = vld [vmem:[#allocation8 + $0x20] ss:$12 sps:$4 sm:$0xff]  }
 0x180   : > { %840 = vmatpush1.bf16.msra.mxu0 %v3162_v3  ;;  %2879 = vmatprep.subr.bf16.mxu1 %v3817_v4  ;;  %v3168_v17 = vld [vmem:[#allocation8 + $0x34] ss:$12 sps:$4 sm:$0xff]   ;;  %v3170_v18 = vld [vmem:[#allocation8 + $0x30] ss:$12 sps:$4 sm:$0xff]   ;;  %v3171_v19 = vld [vmem:[#allocation8 + $0x38] ss:$12 sps:$4 sm:$0xff]  }
 0x181   : > { %841 = vmatprep.subr.bf16.mxu0 %v3164_v6  ;;  %v3172_v20 = vld [vmem:[#allocation8 + $0x4c] ss:$12 sps:$4 sm:$0xff]   ;;  %v3174_v21 = vld [vmem:[#allocation8 + $0x48] ss:$12 sps:$4 sm:$0xff]   ;;  %v3175_v22 = vld [vmem:[#allocation8 + $0x50] ss:$12 sps:$4 sm:$0xff]   ;;  %871 = vmatprep.mubr.bf16.mxu0 %v3818_v30 }
 0x182   : > { %624 = vadd.xlane.f32.xlu0 %v619_v1  ;;  %v3176_v23 = vld [vmem:[#allocation8 + $0x64] ss:$12 sps:$4 sm:$0xff]   ;;  %v3178_v24 = vld [vmem:[#allocation8 + $0x60] ss:$12 sps:$4 sm:$0xff]   ;;  %v3179_v25 = vld [vmem:[#allocation8 + $0x68] ss:$12 sps:$4 sm:$0xff]  }
 0x183   : > { %2880 = vmatpush3.bf16.msra.mxu1 %v3167_v16  ;;  %v3180_v26 = vld [vmem:[#allocation8 + $0x7c] ss:$12 sps:$4 sm:$0xff]   ;;  %v3182_v27 = vld [vmem:[#allocation8 + $0x78] ss:$12 sps:$4 sm:$0xff]   ;;  %v3183_v28 = vld [vmem:[#allocation8 + $0x80] ss:$12 sps:$4 sm:$0xff]  }
 0x184   : > { %842 = vmatpush1.bf16.msra.mxu0 %v3166_v15  ;;  %2881 = vmatprep.subr.bf16.mxu1 %v3817_v4  ;;  %v3184_v29 = vld [vmem:[#allocation8 + $0x94] ss:$12 sps:$4 sm:$0xff]   ;;  %vm3819_vm0 = vmmov 0   ;;  %v3186_v31 = vld [vmem:[#allocation8 + $0x90] ss:$12 sps:$4 sm:$0xff]   ;;  %v4331_v54 = vshrl.u32 %v696_v53, 7 }
 0x185   : > { %843 = vmatprep.subr.bf16.mxu0 %v3168_v17  ;;  %2893 = vmatprep.mubr.msk.bf16.mxu1 %vm3819_vm0, %v3817_v4  ;;  %v3187_v32 = vld [vmem:[#allocation8 + $0x98] ss:$12 sps:$4 sm:$0xff]   ;;  %v3190_v34 = vld [vmem:[#allocation8 + $0xa8] ss:$12 sps:$4 sm:$0xff]   ;;  %v3191_v35 = vld [vmem:[#allocation8 + $0xb0] ss:$12 sps:$4 sm:$0xff]  }
 0x186   : > { %v3188_v33 = vld [vmem:[#allocation8 + $0xac] ss:$12 sps:$4 sm:$0xff]   ;;  %v2675_v44 = vld [vmem:[#allocation5] ss:$0 sm:$0xff]  ;;  %v2676_v48 = vld [vmem:[#allocation7] ss:$0 sm:$0xff] }
 0x187   : > { %2882 = vmatpush3.bf16.msra.mxu1 %v3171_v19  ;;  %v698_v55 = vsub.s32 0, %v4331_v54  ;;  %v706_v56 = vsub.s32 2, %v4331_v54  ;;  %v694_v57 = vld [vmem:[#allocation10] sm:$0x7]  ;;  %v702_v58 = vsub.s32 1, %v4331_v54  ;;  %vm926_vm1 = vcmask 261120  }
 0x188   : > { %844 = vmatpush1.bf16.msra.mxu0 %v3170_v18  ;;  %2883 = vmatprep.subr.bf16.mxu1 %v3817_v4  ;;  %s3820_s1 = smov 96   ;;  %vm976_vm2 = vcmask 130048   ;;  %s3821_s3 = smov 64  }
 0x189   : > { %845 = vmatprep.subr.bf16.mxu0 %v3172_v20  ;;  %v699_v59 = vrot.slane %v694_v57, %v698_v55  ;;  %v707_v60 = vrot.slane %v694_v57, %v706_v56  ;;  %v703_v63 = vrot.slane %v694_v57, %v702_v58  ;;  %s3822_s30 = smov 32   ;;  %s616_s13 = scalar_lea.vmem [#allocation23], %s2661_s21 }
 0x18a   : > { %s2455_s19 = sshll.u32 %s616_s13, 4  ;;  %s2795_s14 = sshll.u32 %s4630_s15, 8  ;;  %s4530_s19 = int_to_ptr.vmem [resolvable:$true] %s2455_s19 }
 0x18b   : > { %2884 = vmatpush3.bf16.msra.mxu1 %v3175_v22  ;;  %s4643_s16 = sld [smem:[#allocation38_spill]]  ;;  %s2442_s21 = scalar_lea.sflag [#allocation4], %s4266_s24 }
 0x18c   : > { %846 = vmatpush1.bf16.msra.mxu0 %v3174_v21  ;;  %2885 = vmatprep.subr.bf16.mxu1 %v3817_v4  ;;  %p4644_p8 = scmp.ne.s32.totalorder %s4624_s22, 0  ;;  %s3823_s15 = smov [#allocation23]  }
 0x18d   : > { %847 = vmatprep.subr.bf16.mxu0 %v3176_v23 }
 0x18f   : > { %2886 = vmatpush3.bf16.msra.mxu1 %v3179_v25 }
 0x190   : > { %848 = vmatpush1.bf16.msra.mxu0 %v3178_v24  ;;  %2887 = vmatprep.subr.bf16.mxu1 %v3817_v4 }
 0x191   : > { %849 = vmatprep.subr.bf16.mxu0 %v3180_v26 }
 0x193   : > { %2888 = vmatpush3.bf16.msra.mxu1 %v3183_v28 }
 0x194   : > { %850 = vmatpush1.bf16.msra.mxu0 %v3182_v27  ;;  %2889 = vmatprep.subr.bf16.mxu1 %v3817_v4 }
 0x195   : > { %851 = vmatprep.subr.bf16.mxu0 %v3184_v29 }
 0x197   : > { %2890 = vmatpush3.bf16.msra.mxu1 %v3187_v32 }
 0x198   : > { %852 = vmatpush1.bf16.msra.mxu0 %v3186_v31  ;;  %2891 = vmatprep.subr.bf16.mxu1 %v3817_v4 }
 0x199   : > { %853 = vmatprep.subr.bf16.mxu0 %v3188_v33 }
 0x19b   : > { %2892 = vmatpush3.bf16.msra.mxu1 %v3191_v35 }
 0x19c   : > { %854 = vmatpush1.bf16.msra.mxu0 %v3190_v34  ;;  %2903 = vmatprep.subr.bf16.mxu1 %v3817_v4 }
 0x19d   : > { %2897 = vmatprep.subr.bf16.mxu0 %v3817_v4 }
 0x20b   : > { %v623_v7 = vpop.xlane.xlu0 %622 }
 0x20c   : > { %v627_v8 = vmul.f32 0.0078125, %v623_v7 }
 0x20e   : > { %v4306_v9 = vsub.f32 %v618_v0, %v627_v8 }
 0x20f   : > { %v625_v10 = vpop.xlane.xlu0 %624 }
 0x210   : > { %v628_v11 = vmul.f32 0.0078125, %v625_v10  ;;  %v631_v12 = vmul.f32 %v4306_v9, %v4306_v9 }
 0x212   : > { %v4310_v13 = vsub.f32 %v619_v1, %v628_v11  ;;  %633 = vadd.xlane.f32.xlu1 %v631_v12 }
 0x214   : > { %v632_v14 = vmul.f32 %v4310_v13, %v4310_v13 }
 0x216   : > { %635 = vadd.xlane.f32.xlu1 %v632_v14 }
 0x29f   : > { %v634_v36 = vpop.xlane.xlu1 %633 }
 0x2a0   : > { %v637_v37 = vmul.f32 0.0078125, %v634_v36 }
 0x2a2   : > { %v639_v38 = vadd.f32 1e-05, %v637_v37 }
 0x2a3   : > { %v636_v39 = vpop.xlane.xlu1 %635 }
 0x2a4   : > { %3280 = vrsqrt.f32 %v639_v38  ;;  %v638_v40 = vmul.f32 0.0078125, %v636_v39 }
 0x2a6   : > { %v640_v41 = vadd.f32 1e-05, %v638_v40 }
 0x2a8   : > { %3282 = vrsqrt.f32 %v640_v41 }
 0x2ae   : > { %v3281_v42 = vpop.eup %3280 }
 0x2af   : > { %v643_v43 = vmul.f32 %v3281_v42, %v4306_v9 }
 0x2b1   : > { %v651_v47 = vmul.f32 %v2675_v44, %v643_v43 }
 0x2b2   : > { %v3283_v45 = vpop.eup %3282 }
 0x2b3   : > { %v644_v46 = vmul.f32 %v3283_v45, %v4310_v13  ;;  %v659_v50 = vadd.f32 %v2676_v48, %v651_v47 }
 0x2b5   : > { %v652_v49 = vmul.f32 %v2675_v44, %v644_v46 }
 0x2b7   : > { %v660_v51 = vadd.f32 %v2676_v48, %v652_v49 }
 0x2b9   : > { %v661_v52 = vpack.c.bf16 %v660_v51, %v659_v50 }
 0x2bb   : > { %872 = vmatmul.mubr.bf16.vlgmr.msra.gmra.mrb[0].mxu0 %v661_v52  ;;  %2894 = vmatmul.mubr.bf16.vlgmr.msra.gmra.mrb[0].mxu1 %v661_v52 }
 0x2bc   : > { %2899 = vmatprep.mubr.msk.bf16.mxu0 %vm3819_vm0, %v3817_v4  ;;  %2905 = vmatprep.mubr.msk.bf16.mxu1 %vm3819_vm0, %v3817_v4 }
 0x38e   : > { %v873_v61 = vpop.f32.mrb[0].mxu0  ;;  %v916_v62 = vpop.f32.mrb[0].mxu1 }
 0x38f   : > { %v875_v0 = vpop.f32.mrb[1].mxu0  ;;  %v2895_v1 = vpop.f32.mrb[1].mxu1  ;;  %v874_v5 = vadd.f32 %v873_v61, %v699_v59  ;;  %v917_v6 = vadd.f32 %v916_v62, %v707_v60 }
 0x390   : > { %v877_v2 = vpop.f32.mrb[2].mxu0  ;;  %v919_v3 = vpop.f32.mrb[2].mxu1  ;;  %v876_v11 = vadd.f32 %v875_v0, %v703_v63 }
 0x391   : > { %v878_v7 = vadd.f32 %v877_v2, %v699_v59  ;;  %v920_v8 = vadd.f32 %v919_v3, %v707_v60  ;;  %v879_v9 = vpop.f32.mrb[3].mxu0  ;;  %v2896_v10 = vpop.f32.mrb[3].mxu1 }
 0x392   : > { %v880_v12 = vadd.f32 %v879_v9, %v703_v63 }
 0x393   : > { %v4342_v13 = vpack.c.bf16 %v878_v7, %v874_v5  ;;  %v4344_v14 = vpack.c.bf16 %v920_v8, %v917_v6  ;;  %v3194_v5 = vld [vmem:[#allocation11 + $0x10] sm:$0xff]   ;;  %v3195_v6 = vld [vmem:[#allocation11 + $0x18] sm:$0xff]  }
 0x394   : > { %v4346_v15 = vpack.c.bf16 %v880_v12, %v876_v11 }
 0x395   : > { %2904 = vmatpush3.bf16.msra.mxu1 %v4344_v14  ;;  %1050 = vrot.lane.b32.xlu1 %v4342_v13, %s3820_s1 }
 0x396   : > { %1053 = vrot.lane.b32.xlu0 %v4346_v15, %s3820_s1  ;;  %v931_v16 = vsel %vm926_vm1, %v4346_v15, 0  ;;  %2915 = vmatprep.subr.bf16.mxu1 %v3817_v4 }
 0x397   : > { %2898 = vmatpush3.bf16.xpose.msra.mxu0 %v931_v16 }
 0x398   : > { %2909 = vmatprep.subr.bf16.mxu0 %v3817_v4 }
 0x39e   : > { %2900 = vmatmul.mubr.msk.bf16.vlgmr.msra.gmra.mrb[4].mxu0 %vm926_vm1, %v4342_v13 }
 0x39f   : > { %2911 = vmatprep.mubr.msk.bf16.mxu0 %vm3819_vm0, %v3817_v4 }
 0x407   : > { %v1051_v19 = vpop.permute.xlu1 %1050 }
 0x408   : > { %v1054_v17 = vpop.permute.xlu0 %1053 }
 0x409   : > { %v1059_v18 = vsel %vm926_vm1, %v1054_v17, 0  ;;  %v3192_v17 = vld [vmem:[#allocation11] sm:$0xff]  }
 0x40a   : > { %2910 = vmatpush3.bf16.xpose.msra.mxu0 %v1059_v18 }
 0x40b   : > { %2921 = vmatprep.subr.bf16.mxu0 %v3817_v4 }
 0x411   : > { %2912 = vmatmul.mubr.msk.bf16.vlgmr.msra.gmra.mrb[8].mxu0 %vm926_vm1, %v1051_v19  ;;  %v3193_v19 = vld [vmem:[#allocation11 + $0x8] sm:$0xff]  }
 0x412   : > { %2925 = vmatprep.mubr.msk.bf16.mxu0 %vm3819_vm0, %v3817_v4  ;;  %2922 = vmatpush3.bf16.msra.mxu0 %v3194_v5 }
 0x413   : > { %2923 = vmatprep.subr.bf16.mxu0 %v3817_v4 }
 0x416   : > { %2924 = vmatpush3.bf16.msra.mxu0 %v3195_v6 }
 0x417   : > { %2937 = vmatprep.subr.bf16.mxu0 %v3817_v4 }
 0x471   : > { %v967_v20 = vpop.f32.mrb[4].mxu0 }
 0x472   : > { %v974_v21 = vmul.f32 0.17677669, %v967_v20  ;;  %v2901_v22 = vpop.f32.mrb[5].mxu0 }
 0x473   : > { %v970_v23 = vpop.f32.mrb[6].mxu0 }
 0x474   : > { %v975_v24 = vmul.f32 0.17677669, %v970_v23  ;;  %v2902_v25 = vpop.f32.mrb[7].mxu0  ;;  %v977_v26 = vsel %vm976_vm2, %v974_v21, -inf }
 0x475   : > { %978 = vmax.xlane.f32.xlu1 %v977_v26 }
 0x476   : > { %v980_v27 = vsel %vm976_vm2, %v975_v24, -inf }
 0x477   : > { %981 = vmax.xlane.f32.xlu0 %v980_v27 }
 0x4e4   : > { %v1095_v28 = vpop.f32.mrb[8].mxu0 }
 0x4e5   : > { %v1102_v29 = vmul.f32 0.17677669, %v1095_v28  ;;  %v2913_v31 = vpop.f32.mrb[9].mxu0 }
 0x4e6   : > { %v1098_v32 = vpop.f32.mrb[10].mxu0 }
 0x4e7   : > { %v1103_v33 = vmul.f32 0.17677669, %v1098_v32  ;;  %v2914_v34 = vpop.f32.mrb[11].mxu0  ;;  %v1104_v35 = vsel %vm976_vm2, %v1102_v29, -inf }
 0x4e8   : > { %1105 = vmax.xlane.f32.xlu0 %v1104_v35 }
 0x4e9   : > { %v1107_v36 = vsel %vm976_vm2, %v1103_v33, -inf }
 0x4ea   : > { %1108 = vmax.xlane.f32.xlu1 %v1107_v36 }
 0x502   : > { %v979_v37 = vpop.xlane.xlu1 %978 }
 0x503   : > { %v983_v38 = vsub.f32 %v974_v21, %v979_v37 }
 0x504   : > { %v982_v39 = vpop.xlane.xlu0 %981 }
 0x505   : > { %v985_v40 = vmul.f32 1.442695, %v983_v38  ;;  %v984_v41 = vsub.f32 %v975_v24, %v982_v39 }
 0x507   : > { %3284 = vpow2.f32 %v985_v40  ;;  %v987_v42 = vmul.f32 1.442695, %v984_v41 }
 0x509   : > { %3286 = vpow2.f32 %v987_v42 }
 0x511   : > { %v3285_v43 = vpop.eup %3284 }
 0x512   : > { %v989_v44 = vsel %vm976_vm2, %v3285_v43, 0.0 }
 0x513   : > { %v3287_v45 = vpop.eup %3286  ;;  %990 = vadd.xlane.f32.xlu0 %v989_v44 }
 0x514   : > { %v992_v46 = vsel %vm976_vm2, %v3287_v45, 0.0 }
 0x515   : > { %993 = vadd.xlane.f32.xlu1 %v992_v46 }
 0x575   : > { %v1106_v47 = vpop.xlane.xlu0 %1105 }
 0x576   : > { %v1110_v48 = vsub.f32 %v1102_v29, %v1106_v47 }
 0x577   : > { %v1109_v49 = vpop.xlane.xlu1 %1108 }
 0x578   : > { %v1112_v50 = vmul.f32 1.442695, %v1110_v48  ;;  %v1111_v51 = vsub.f32 %v1103_v33, %v1109_v49 }
 0x57a   : > { %3288 = vpow2.f32 %v1112_v50  ;;  %v1114_v52 = vmul.f32 1.442695, %v1111_v51 }
 0x57c   : > { %3290 = vpow2.f32 %v1114_v52 }
 0x584   : > { %v3289_v53 = vpop.eup %3288 }
 0x585   : > { %v1116_v57 = vsel %vm976_vm2, %v3289_v53, 0.0 }
 0x586   : > { %v3291_v59 = vpop.eup %3290  ;;  %1117 = vadd.xlane.f32.xlu0 %v1116_v57 }
 0x587   : > { %v1119_v60 = vsel %vm976_vm2, %v3291_v59, 0.0 }
 0x588   : > { %1120 = vadd.xlane.f32.xlu1 %v1119_v60 }
 0x599   : > { %1294 = vrot.lane.b32.xlu1 %v4346_v15, %s3821_s3 }
 0x59c   : > { %1128 = vrot.lane.b32.xlu0 %v4344_v14, %s3820_s1  ;;  %s3704_s1 = scalar_lea.vmem %s4530_s19, 256 }
 0x59d   : > { %1292 = vrot.lane.b32.xlu1 %v4342_v13, %s3821_s3  ;;  %p3705_p2 = scmp.ne.s32.totalorder %s4530_s19, %s3704_s1 }
 0x59f   : > { %p3706_p10 = pnand %p3705_p2, %p4644_p8 }
 0x5a0   : > { %v991_v61 = vpop.xlane.xlu0 %990 }
 0x5a1   : > { %3292 = vrcp.f32 %v991_v61  ;;  %p3707_p11 = pneg %p3706_p10 }
 0x5a2   : > { %v994_v62 = vpop.xlane.xlu1 %993 }
 0x5a3   : > { %3294 = vrcp.f32 %v994_v62 }
 0x5ab   : > { %v3293_v63 = vpop.eup %3292 }
 0x5ac   : > { %v996_v1 = vmul.f32 %v3293_v63, %v3285_v43 }
 0x5ad   : > { %v3295_v0 = vpop.eup %3294 }
 0x5ae   : > { %v998_v2 = vmul.f32 %v3295_v0, %v3287_v45 }
 0x5b0   : > { %v999_v3 = vpack.c.bf16 %v998_v2, %v996_v1 }
 0x5b2   : > { %2906 = vmatmul.mubr.msk.bf16.vlgmr.msra.gmra.mrb[4].mxu1 %vm976_vm2, %v999_v3 }
 0x5b3   : > { %2917 = vmatprep.mubr.msk.bf16.mxu1 %vm3819_vm0, %v3817_v4 }
 0x613   : > { %v1118_v7 = vpop.xlane.xlu0 %1117 }
 0x614   : > { %3296 = vrcp.f32 %v1118_v7 }
 0x615   : > { %v1121_v8 = vpop.xlane.xlu1 %1120 }
 0x616   : > { %3298 = vrcp.f32 %v1121_v8 }
 0x617   : > { %v1129_v9 = vpop.permute.xlu0 %1128 }
 0x618   : > { %2916 = vmatpush3.bf16.msra.mxu1 %v1129_v9 }
 0x619   : > { %2929 = vmatprep.subr.bf16.mxu1 %v3817_v4  ;;  %v1295_v27 = vpop.permute.xlu1 %1294 }
 0x61a   : > { %v1300_v32 = vsel %vm926_vm1, %v1295_v27, 0 }
 0x61d   : > { %v1293_v33 = vpop.permute.xlu1 %1292 }
 0x61e   : > { %v3297_v10 = vpop.eup %3296 }
 0x61f   : > { %v1123_v12 = vmul.f32 %v3297_v10, %v3289_v53 }
 0x620   : > { %v3299_v11 = vpop.eup %3298 }
 0x621   : > { %v1125_v16 = vmul.f32 %v3299_v11, %v3291_v59 }
 0x623   : > { %v1126_v18 = vpack.c.bf16 %v1125_v16, %v1123_v12  ;;  %v3197_v16 = vld [vmem:[#allocation11 + $0x28] sm:$0xff]  }
 0x625   : > { %2918 = vmatmul.mubr.msk.bf16.vlgmr.msra.gmra.mrb[8].mxu1 %vm976_vm2, %v1126_v18 }
 0x626   : > { %2930 = vmatpush3.bf16.msra.mxu1 %v3192_v17  ;;  %2933 = vmatprep.mubr.msk.bf16.mxu1 %vm3819_vm0, %v3817_v4 }
 0x627   : > { %2931 = vmatprep.subr.bf16.mxu1 %v3817_v4 }
 0x62a   : > { %2932 = vmatpush3.bf16.msra.mxu1 %v3193_v19 }
 0x62b   : > { %2943 = vmatprep.subr.bf16.mxu1 %v3817_v4 }
 0x685   : > { %v1037_v20 = vpop.f32.mrb[4].mxu1 }
 0x686   : > { %v2907_v21 = vpop.f32.mrb[5].mxu1 }
 0x687   : > { %v1040_v22 = vpop.f32.mrb[6].mxu1 }
 0x688   : > { %v1044_v23 = vpack.c.bf16 %v1040_v22, %v1037_v20  ;;  %v2908_v24 = vpop.f32.mrb[7].mxu1 }
 0x68a   : > { %2934 = vmatmul.mubr.msk.bf16.vlgmr.msra.gmra.mrb[12].mxu1 %vm926_vm1, %v1044_v23 }
 0x68b   : > { %2945 = vmatprep.mubr.msk.bf16.mxu1 %vm3819_vm0, %v3817_v4 }
 0x6f8   : > { %v1168_v25 = vpop.f32.mrb[8].mxu1 }
 0x6f9   : > { %v2919_v26 = vpop.f32.mrb[9].mxu1 }
 0x6fa   : > { %v1171_v28 = vpop.f32.mrb[10].mxu1 }
 0x6fb   : > { %v1175_v29 = vpack.c.bf16 %v1171_v28, %v1168_v25  ;;  %v2920_v31 = vpop.f32.mrb[11].mxu1 }
 0x6fd   : > { %2926 = vmatmul.mubr.msk.bf16.vlgmr.msra.gmra.mrb[12].mxu0 %vm926_vm1, %v1175_v29 }
 0x6fe   : > { %2938 = vmatpush3.bf16.xpose.msra.mxu0 %v1300_v32  ;;  %2939 = vmatprep.mubr.msk.bf16.mxu0 %vm3819_vm0, %v3817_v4 }
 0x6ff   : > { %2949 = vmatprep.subr.bf16.mxu0 %v3817_v4 }
 0x705   : > { %2940 = vmatmul.mubr.msk.bf16.vlgmr.msra.gmra.mrb[16].mxu0 %vm926_vm1, %v1293_v33 }
 0x706   : > { %2953 = vmatprep.mubr.msk.bf16.mxu0 %vm3819_vm0, %v3817_v4 }
 0x75d   : > { %v1285_v34 = vpop.f32.mrb[12].mxu1 }
 0x75e   : > { %v2935_v35 = vpop.f32.mrb[13].mxu1 }
 0x75f   : > { %v1288_v36 = vpop.f32.mrb[14].mxu1 }
 0x760   : > { %v2936_v37 = vpop.f32.mrb[15].mxu1 }
 0x7d0   : > { %v1229_v38 = vpop.f32.mrb[12].mxu0 }
 0x7d1   : > { %v4402_v39 = vadd.f32 %v1285_v34, %v1229_v38  ;;  %v2927_v40 = vpop.f32.mrb[13].mxu0 }
 0x7d2   : > { %v1232_v41 = vpop.f32.mrb[14].mxu0 }
 0x7d3   : > { %v4404_v42 = vadd.f32 %v1288_v36, %v1232_v41  ;;  %v2928_v43 = vpop.f32.mrb[15].mxu0 }
 0x7d4   : > { %v3198_v43 = vld [vmem:[#allocation11 + $0x30] sm:$0xff]  }
 0x7d8   : > { %v1336_v44 = vpop.f32.mrb[16].mxu0 }
 0x7d9   : > { %v1343_v45 = vmul.f32 0.17677669, %v1336_v44  ;;  %v2941_v46 = vpop.f32.mrb[17].mxu0 }
 0x7da   : > { %v1339_v47 = vpop.f32.mrb[18].mxu0 }
 0x7db   : > { %v1344_v48 = vmul.f32 0.17677669, %v1339_v47  ;;  %v2942_v49 = vpop.f32.mrb[19].mxu0  ;;  %v1345_v50 = vsel %vm976_vm2, %v1343_v45, -inf }
 0x7dc   : > { %1346 = vmax.xlane.f32.xlu1 %v1345_v50 }
 0x7dd   : > { %v1348_v51 = vsel %vm976_vm2, %v1344_v48, -inf }
 0x7de   : > { %1349 = vmax.xlane.f32.xlu0 %v1348_v51 }
 0x7ed   : > { %1368 = vrot.lane.b32.xlu1 %v4344_v14, %s3821_s3  ;;  %s3708_s3 = sshll.u32 %s3823_s15, 4  ;;  %s3709_s3 = int_to_ptr.vmem [resolvable:$false] %s3708_s3 }
 0x7ee   : > { %p3711_p12 = scmp.lt.s32.totalorder %s4530_s19, %s3709_s3 }
 0x7f1   : > { %1478 = vrot.lane.b32.xlu1 %v4342_v13, %s3822_s30  ;;  %v3196_v13 = vld [vmem:[#allocation11 + $0x20] sm:$0xff]  }
 0x7f2   : > { %2950 = vmatpush3.bf16.msra.mxu0 %v3196_v13 }
 0x7f3   : > { %2951 = vmatprep.subr.bf16.mxu0 %v3817_v4 }
 0x7f6   : > { %2952 = vmatpush3.bf16.msra.mxu0 %v3197_v16  ;;  %v3203_v16 = vld [vmem:[#allocation17 + $0x8] ss:$16 sps:$4 sm:$0xff]  }
 0x7f7   : > { %2963 = vmatprep.subr.bf16.mxu0 %v3817_v4 }
 0x869   : > { %v1347_v52 = vpop.xlane.xlu1 %1346 }
 0x86a   : > { %v1351_v53 = vsub.f32 %v1343_v45, %v1347_v52 }
 0x86b   : > { %v1350_v57 = vpop.xlane.xlu0 %1349 }
 0x86c   : > { %v1353_v59 = vmul.f32 1.442695, %v1351_v53  ;;  %v1352_v60 = vsub.f32 %v1344_v48, %v1350_v57 }
 0x86d   : > { %v1369_v61 = vpop.permute.xlu1 %1368 }
 0x86e   : > { %3300 = vpow2.f32 %v1353_v59  ;;  %v1355_v62 = vmul.f32 1.442695, %v1352_v60  ;;  %2944 = vmatpush3.bf16.msra.mxu1 %v1369_v61 }
 0x86f   : > { %2957 = vmatprep.subr.bf16.mxu1 %v3817_v4 }
 0x870   : > { %3302 = vpow2.f32 %v1355_v62 }
 0x878   : > { %v3301_v63 = vpop.eup %3300 }
 0x879   : > { %v1357_v0 = vsel %vm976_vm2, %v3301_v63, 0.0 }
 0x87a   : > { %v3303_v1 = vpop.eup %3302  ;;  %1358 = vadd.xlane.f32.xlu0 %v1357_v0 }
 0x87b   : > { %v1360_v2 = vsel %vm976_vm2, %v3303_v1, 0.0 }
 0x87e   : > { %1361 = vadd.xlane.f32.xlu0 %v1360_v2 }
 0x894   : > { %1480 = vrot.lane.b32.xlu0 %v4346_v15, %s3822_s30  ;;  %v1479_v15 = vpop.permute.xlu1 %1478 }
 0x907   : > { %v1359_v3 = vpop.xlane.xlu0 %1358 }
 0x908   : > { %3304 = vrcp.f32 %v1359_v3  ;;  %v2721_v3 = vld [vmem:[#allocation13] ss:$0 sm:$0xff] }
 0x90b   : > { %v1362_v5 = vpop.xlane.xlu0 %1361 }
 0x90c   : > { %3306 = vrcp.f32 %v1362_v5  ;;  %v3336_v5 = vld [vmem:[%s4272_s25] sm:$0xff] }
 0x90f   : > { %v1481_v10 = vpop.permute.xlu0 %1480 }
 0x910   : > { %v1486_v12 = vsel %vm926_vm1, %v1481_v10, 0 }
 0x912   : > { %v3305_v6 = vpop.eup %3304 }
 0x913   : > { %v1364_v8 = vmul.f32 %v3305_v6, %v3301_v63 }
 0x916   : > { %v3307_v7 = vpop.eup %3306 }
 0x917   : > { %v1366_v9 = vmul.f32 %v3307_v7, %v3303_v1 }
 0x919   : > { %v1367_v11 = vpack.c.bf16 %v1366_v9, %v1364_v8  ;;  %v3337_v9 = vld [vmem:[%s4272_s25 + $0x8] sm:$0xff]  ;;  %s4535_s25 = scalar_lea.hbm %s4643_s16, %s2795_s14 }
 0x91b   : > { %2946 = vmatmul.mubr.msk.bf16.vlgmr.msra.gmra.mrb[16].mxu1 %vm976_vm2, %v1367_v11 }
 0x91c   : > { %2958 = vmatpush3.bf16.xpose.msra.mxu1 %v1486_v12  ;;  %2959 = vmatprep.mubr.msk.bf16.mxu1 %vm3819_vm0, %v3817_v4 }
 0x91d   : > { %2969 = vmatprep.subr.bf16.mxu1 %v3817_v4 }
 0x923   : > { %2960 = vmatmul.mubr.msk.bf16.vlgmr.msra.gmra.mrb[20].mxu1 %vm926_vm1, %v1479_v15  ;;  %v3202_v15 = vld [vmem:[#allocation17 + $0x4] ss:$16 sps:$4 sm:$0xff]  }
 0x924   : > { %2973 = vmatprep.mubr.msk.bf16.mxu1 %vm3819_vm0, %v3817_v4  ;;  %2970 = vmatpush3.bf16.msra.mxu1 %v3198_v43  ;;  %v3224_v43 = vld [vmem:[#allocation17 + $0x80] ss:$16 sps:$4 sm:$0xff]  }
 0x925   : > { %2971 = vmatprep.subr.bf16.mxu1 %v3817_v4 }
 0x9ee   : > { %v1408_v17 = vpop.f32.mrb[16].mxu1 }
 0x9ef   : > { %v2947_v18 = vpop.f32.mrb[17].mxu1 }
 0x9f0   : > { %v1411_v19 = vpop.f32.mrb[18].mxu1  ;;  %v3208_v18 = vld [vmem:[#allocation17 + $0x24] ss:$16 sps:$4 sm:$0xff]  }
 0x9f1   : > { %v1415_v20 = vpack.c.bf16 %v1411_v19, %v1408_v17  ;;  %v2948_v21 = vpop.f32.mrb[19].mxu1  ;;  %v3205_v17 = vld [vmem:[#allocation17 + $0xc] ss:$16 sps:$4 sm:$0xff]  }
 0x9f2   : > { %v3211_v19 = vld [vmem:[#allocation17 + $0x2c] ss:$16 sps:$4 sm:$0xff]   ;;  %v3209_v21 = vld [vmem:[#allocation17 + $0x28] ss:$16 sps:$4 sm:$0xff]  }
 0x9f3   : > { %2954 = vmatmul.mubr.msk.bf16.vlgmr.msra.gmra.mrb[20].mxu0 %vm926_vm1, %v1415_v20  ;;  %v3206_v20 = vld [vmem:[#allocation17 + $0x20] ss:$16 sps:$4 sm:$0xff]  }
 0x9f4   : > { %2965 = vmatprep.mubr.msk.bf16.mxu0 %vm3819_vm0, %v3817_v4  ;;  %v3199_v4 = vld [vmem:[#allocation11 + $0x38] sm:$0xff]  }
 0x9f5   : > { %2972 = vmatpush3.bf16.msra.mxu1 %v3199_v4 }
 0x9f6   : > { %v1522_v22 = vpop.f32.mrb[20].mxu1  ;;  %1973 = vmatprep.subr.bf16.mxu1 %v3205_v17  ;;  %v3252_v17 = vld [vmem:[#allocation20 + $0x48] sm:$0xff]  }
 0x9f7   : > { %v1529_v23 = vmul.f32 0.17677669, %v1522_v22  ;;  %v2961_v24 = vpop.f32.mrb[21].mxu1 }
 0x9f8   : > { %v1525_v25 = vpop.f32.mrb[22].mxu1 }
 0x9f9   : > { %v1530_v26 = vmul.f32 0.17677669, %v1525_v25  ;;  %v2962_v27 = vpop.f32.mrb[23].mxu1  ;;  %v1531_v28 = vsel %vm976_vm2, %v1529_v23, -inf }
 0x9fa   : > { %1532 = vmax.xlane.f32.xlu1 %v1531_v28 }
 0x9fb   : > { %v1534_v29 = vsel %vm976_vm2, %v1530_v26, -inf }
 0x9fc   : > { %1535 = vmax.xlane.f32.xlu0 %v1534_v29 }
 0xa87   : > { %v1533_v31 = vpop.xlane.xlu1 %1532 }
 0xa88   : > { %v1537_v32 = vsub.f32 %v1529_v23, %v1533_v31  ;;  %v3214_v31 = vld [vmem:[#allocation17 + $0x44] ss:$16 sps:$4 sm:$0xff]  }
 0xa89   : > { %v1536_v33 = vpop.xlane.xlu0 %1535 }
 0xa8a   : > { %v1539_v34 = vmul.f32 1.442695, %v1537_v32  ;;  %v1538_v35 = vsub.f32 %v1530_v26, %v1536_v33  ;;  %v3217_v32 = vld [vmem:[#allocation17 + $0x4c] ss:$16 sps:$4 sm:$0xff]   ;;  %v3212_v33 = vld [vmem:[#allocation17 + $0x40] ss:$16 sps:$4 sm:$0xff]  }
 0xa8c   : > { %3308 = vpow2.f32 %v1539_v34  ;;  %v1541_v36 = vmul.f32 1.442695, %v1538_v35  ;;  %v3215_v34 = vld [vmem:[#allocation17 + $0x48] ss:$16 sps:$4 sm:$0xff]   ;;  %v3220_v35 = vld [vmem:[#allocation17 + $0x64] ss:$16 sps:$4 sm:$0xff]  }
 0xa8e   : > { %3310 = vpow2.f32 %v1541_v36  ;;  %v3223_v36 = vld [vmem:[#allocation17 + $0x6c] ss:$16 sps:$4 sm:$0xff]  }
 0xa96   : > { %v3309_v37 = vpop.eup %3308 }
 0xa97   : > { %v1543_v38 = vsel %vm976_vm2, %v3309_v37, 0.0 }
 0xa98   : > { %v3311_v40 = vpop.eup %3310  ;;  %1544 = vadd.xlane.f32.xlu0 %v1543_v38  ;;  %v3221_v38 = vld [vmem:[#allocation17 + $0x68] ss:$16 sps:$4 sm:$0xff]  }
 0xa99   : > { %v1546_v41 = vsel %vm976_vm2, %v3311_v40, 0.0 }
 0xa9a   : > { %1547 = vadd.xlane.f32.xlu1 %v1546_v41  ;;  %v3229_v41 = vld [vmem:[#allocation17 + $0x8c] ss:$16 sps:$4 sm:$0xff]  }
 0xaae   : > { %1554 = vrot.lane.b32.xlu0 %v4344_v14, %s3822_s30  ;;  %s3710_s30 = scalar_lea.vmem %s3709_s3, 512 }
 0xaaf   : > { %p3712_p0 = scmp.lt.s32.totalorder %s3710_s30, %s3704_s1 }
 0xab1   : > { %p3713_p5 = por %p3712_p0, %p3711_p12 }
 0xab3   : > { %p3714_p7 = pnand %p3713_p5, %p3707_p11 }
 0xac6   : > { %v1469_v44 = vpop.f32.mrb[20].mxu0 }
 0xac7   : > { %v1476_v45 = vadd.f32 %v1469_v44, %v4402_v39  ;;  %v2955_v46 = vpop.f32.mrb[21].mxu0  ;;  %v3227_v44 = vld [vmem:[#allocation17 + $0x88] ss:$16 sps:$4 sm:$0xff]  }
 0xac8   : > { %v1472_v47 = vpop.f32.mrb[22].mxu0  ;;  %v3235_v46 = vld [vmem:[#allocation17 + $0xac] ss:$16 sps:$4 sm:$0xff]  }
 0xac9   : > { %v1477_v48 = vadd.f32 %v1472_v47, %v4404_v42  ;;  %v2956_v49 = vpop.f32.mrb[23].mxu0  ;;  %v3230_v47 = vld [vmem:[#allocation17 + $0xa0] ss:$16 sps:$4 sm:$0xff]  }
 0xaca   : > { %v3238_v49 = vld [vmem:[#allocation17 + $0xc4] ss:$16 sps:$4 sm:$0xff]  }
 0xb25   : > { %v1545_v50 = vpop.xlane.xlu0 %1544 }
 0xb26   : > { %3312 = vrcp.f32 %v1545_v50  ;;  %v3241_v50 = vld [vmem:[#allocation17 + $0xcc] ss:$16 sps:$4 sm:$0xff]  }
 0xb27   : > { %v1548_v51 = vpop.xlane.xlu1 %1547 }
 0xb28   : > { %3314 = vrcp.f32 %v1548_v51  ;;  %v3236_v51 = vld [vmem:[#allocation17 + $0xc0] ss:$16 sps:$4 sm:$0xff]  }
 0xb29   : > { %v1555_v52 = vpop.permute.xlu0 %1554 }
 0xb2a   : > { %2964 = vmatpush3.bf16.msra.mxu0 %v1555_v52  ;;  %v3239_v52 = vld [vmem:[#allocation17 + $0xc8] ss:$16 sps:$4 sm:$0xff]  }
 0xb2b   : > { %1930 = vmatprep.subr.bf16.mxu0 %v3202_v15  ;;  %v3250_v15 = vld [vmem:[#allocation20] sm:$0xff]  }
 0xb30   : > { %v3313_v53 = vpop.eup %3312 }
 0xb31   : > { %v1550_v57 = vmul.f32 %v3313_v53, %v3309_v37  ;;  %v3218_v37 = vld [vmem:[#allocation17 + $0x60] ss:$16 sps:$4 sm:$0xff]   ;;  %v3244_v53 = vld [vmem:[#allocation17 + $0xe4] ss:$16 sps:$4 sm:$0xff]  }
 0xb32   : > { %v3315_v14 = vpop.eup %3314 }
 0xb33   : > { %v1552_v59 = vmul.f32 %v3315_v14, %v3311_v40  ;;  %v3226_v40 = vld [vmem:[#allocation17 + $0x84] ss:$16 sps:$4 sm:$0xff]   ;;  %v3247_v14 = vld [vmem:[#allocation17 + $0xec] ss:$16 sps:$4 sm:$0xff]  }
 0xb35   : > { %v1553_v60 = vpack.c.bf16 %v1552_v59, %v1550_v57  ;;  %v3242_v57 = vld [vmem:[#allocation17 + $0xe0] ss:$16 sps:$4 sm:$0xff]   ;;  %v3245_v59 = vld [vmem:[#allocation17 + $0xe8] ss:$16 sps:$4 sm:$0xff]  }
 0xb37   : > { %2966 = vmatmul.mubr.msk.bf16.vlgmr.msra.gmra.mrb[24].mxu0 %vm976_vm2, %v1553_v60 }
 0xb38   : > { %1962 = vmatprep.mubr.bf16.mxu0 %v3818_v30 }
 0xc0a   : > { %v1594_v39 = vpop.f32.mrb[24].mxu0 }
 0xc0b   : > { %v2967_v42 = vpop.f32.mrb[25].mxu0 }
 0xc0c   : > { %v1597_v61 = vpop.f32.mrb[26].mxu0 }
 0xc0d   : > { %v1601_v62 = vpack.c.bf16 %v1597_v61, %v1594_v39  ;;  %v2968_v63 = vpop.f32.mrb[27].mxu0 }
 0xc0f   : > { %2974 = vmatmul.mubr.msk.bf16.vlgmr.msra.gmra.mrb[24].mxu1 %vm926_vm1, %v1601_v62 }
 0xc10   : > { %2005 = vmatprep.mubr.bf16.mxu1 %v3818_v30  ;;  %v3200_v30 = vld [vmem:[#allocation17] ss:$16 sps:$4 sm:$0xff]   ;;  %1974 = vmatpush1.bf16.msra.mxu1 %v3203_v16  ;;  %v3251_v16 = vld [vmem:[#allocation20 + $0x80] sm:$0xff]  }
 0xc11   : > { %1931 = vmatpush1.bf16.msra.mxu0 %v3200_v30  ;;  %1975 = vmatprep.subr.bf16.mxu1 %v3211_v19  ;;  %v3249_v30 = vld [vmem:[#allocation20 + $0xc0] sm:$0xff]   ;;  %v3254_v19 = vld [vmem:[#allocation20 + $0x8] sm:$0xff]  }
 0xc12   : > { %1932 = vmatprep.subr.bf16.mxu0 %v3208_v18  ;;  %v3253_v18 = vld [vmem:[#allocation20 + $0xc8] sm:$0xff]  }
 0xc14   : > { %1976 = vmatpush1.bf16.msra.mxu1 %v3209_v21  ;;  %v3256_v21 = vld [vmem:[#allocation20 + $0x50] sm:$0xff]  }
 0xc15   : > { %1933 = vmatpush1.bf16.msra.mxu0 %v3206_v20  ;;  %1977 = vmatprep.subr.bf16.mxu1 %v3217_v32  ;;  %v3255_v20 = vld [vmem:[#allocation20 + $0x88] sm:$0xff]   ;;  %v3266_v32 = vld [vmem:[#allocation20 + $0x20] sm:$0xff]  }
 0xc16   : > { %1934 = vmatprep.subr.bf16.mxu0 %v3214_v31  ;;  %v3265_v31 = vld [vmem:[#allocation20 + $0xe0] sm:$0xff]  }
 0xc18   : > { %1978 = vmatpush1.bf16.msra.mxu1 %v3215_v34  ;;  %v3268_v34 = vld [vmem:[#allocation20 + $0x68] sm:$0xff]  }
 0xc19   : > { %1935 = vmatpush1.bf16.msra.mxu0 %v3212_v33  ;;  %1979 = vmatprep.subr.bf16.mxu1 %v3223_v36  ;;  %v3267_v33 = vld [vmem:[#allocation20 + $0xa0] sm:$0xff]   ;;  %v3270_v36 = vld [vmem:[#allocation20 + $0x28] sm:$0xff]  }
 0xc1a   : > { %1936 = vmatprep.subr.bf16.mxu0 %v3220_v35  ;;  %v3269_v35 = vld [vmem:[#allocation20 + $0xe8] sm:$0xff]  }
 0xc1c   : > { %1980 = vmatpush1.bf16.msra.mxu1 %v3221_v38  ;;  %v3272_v38 = vld [vmem:[#allocation20 + $0x70] sm:$0xff]  }
 0xc1d   : > { %1937 = vmatpush1.bf16.msra.mxu0 %v3218_v37  ;;  %1981 = vmatprep.subr.bf16.mxu1 %v3229_v41  ;;  %v3271_v37 = vld [vmem:[#allocation20 + $0xa8] sm:$0xff]   ;;  %v3274_v41 = vld [vmem:[#allocation20 + $0x30] sm:$0xff]  }
 0xc1e   : > { %1938 = vmatprep.subr.bf16.mxu0 %v3226_v40  ;;  %v3273_v40 = vld [vmem:[#allocation20 + $0xf0] sm:$0xff]  }
 0xc20   : > { %1982 = vmatpush1.bf16.msra.mxu1 %v3227_v44  ;;  %v3276_v44 = vld [vmem:[#allocation20 + $0x78] sm:$0xff]  }
 0xc21   : > { %1939 = vmatpush1.bf16.msra.mxu0 %v3224_v43  ;;  %1983 = vmatprep.subr.bf16.mxu1 %v3235_v46  ;;  %v3275_v43 = vld [vmem:[#allocation20 + $0xb0] sm:$0xff]   ;;  %v3278_v46 = vld [vmem:[#allocation20 + $0x38] sm:$0xff]  }
 0xce2   : > { %v1655_v0 = vpop.f32.mrb[24].mxu1 }
 0xce3   : > { %v1662_v1 = vadd.f32 %v1655_v0, %v1476_v45  ;;  %v2975_v2 = vpop.f32.mrb[25].mxu1  ;;  %v3232_v45 = vld [vmem:[#allocation17 + $0xa4] ss:$16 sps:$4 sm:$0xff]  }
 0xce4   : > { %v1658_v13 = vpop.f32.mrb[26].mxu1  ;;  %1940 = vmatprep.subr.bf16.mxu0 %v3232_v45  ;;  %v3277_v45 = vld [vmem:[#allocation20 + $0xf8] sm:$0xff]  }
 0xce5   : > { %v1664_v6 = vadd.f32 %v3336_v5, %v1662_v1  ;;  %v1663_v7 = vadd.f32 %v1658_v13, %v1477_v48  ;;  %v2976_v8 = vpop.f32.mrb[27].mxu1  ;;  %v3233_v48 = vld [vmem:[#allocation17 + $0xa8] ss:$16 sps:$4 sm:$0xff]   ;;  %1941 = vmatpush1.bf16.msra.mxu0 %v3230_v47  ;;  %v2722_v1 = vld [vmem:[#allocation14] ss:$0 sm:$0xff] }
 0xce6   : > { %1984 = vmatpush1.bf16.msra.mxu1 %v3233_v48  ;;  %1942 = vmatprep.subr.bf16.mxu0 %v3238_v49  ;;  %v2723_v5 = vld [vmem:[#allocation16] ss:$0 sm:$0xff]  ;;  %v1748_v48 = vld [vmem:[#allocation19] sm:$0xf]  ;;  %v1764_v49 = vsub.s32 3, %v4331_v54 }
 0xce7   : > { %v1665_v10 = vadd.f32 %v3337_v9, %v1663_v7  ;;  %v4445_v11 = vadd.f32 %v2721_v3, %v1664_v6  ;;  %1985 = vmatprep.subr.bf16.mxu1 %v3241_v50  ;;  %v3279_v47 = vld [vmem:[#allocation20 + $0xb8] sm:$0xff]   ;;  %v1753_v50 = vrot.slane %v1748_v48, %v698_v55 }
 0xce9   : > { %1677 = vadd.xlane.f32.xlu1 %v4445_v11  ;;  %v4448_v12 = vadd.f32 %v2721_v3, %v1665_v10  ;;  %1943 = vmatpush1.bf16.msra.mxu0 %v3236_v51  ;;  %v3248_v10 = vld [vmem:[#allocation20 + $0x40] sm:$0xff]   ;;  %v1761_v51 = vrot.slane %v1748_v48, %v706_v56 }
 0xcea   : > { %1986 = vmatpush1.bf16.msra.mxu1 %v3239_v52  ;;  %1944 = vmatprep.subr.bf16.mxu0 %v3244_v53  ;;  %v1757_v52 = vrot.slane %v1748_v48, %v702_v58  ;;  %v1765_v53 = vrot.slane %v1748_v48, %v1764_v49 }
 0xceb   : > { %1987 = vmatprep.subr.bf16.mxu1 %v3247_v14 }
 0xced   : > { %1679 = vadd.xlane.f32.xlu1 %v4448_v12  ;;  %1945 = vmatpush1.bf16.msra.mxu0 %v3242_v57 }
 0xcee   : > { %1988 = vmatpush1.bf16.msra.mxu1 %v3245_v59  ;;  %2833 = vmatprep.subr.bf16.mxu0 %v3248_v10 }
 0xcef   : > { %2855 = vmatprep.subr.bf16.mxu1 %v3249_v30 }
 0xd76   : > { %v1678_v22 = vpop.xlane.xlu1 %1677 }
 0xd77   : > { %v1681_v23 = vmul.f32 0.0078125, %v1678_v22  ;;  %v3257_v22 = vld [vmem:[#allocation20 + $0xd0] sm:$0xff]  }
 0xd79   : > { %v4452_v24 = vsub.f32 %v4445_v11, %v1681_v23  ;;  %v3258_v23 = vld [vmem:[#allocation20 + $0x10] sm:$0xff]  }
 0xd7a   : > { %v1680_v25 = vpop.xlane.xlu1 %1679 }
 0xd7b   : > { %v1682_v26 = vmul.f32 0.0078125, %v1680_v25  ;;  %v1685_v27 = vmul.f32 %v4452_v24, %v4452_v24  ;;  %v3260_v25 = vld [vmem:[#allocation20 + $0x58] sm:$0xff]  }
 0xd7d   : > { %v4457_v28 = vsub.f32 %v4448_v12, %v1682_v26  ;;  %1687 = vadd.xlane.f32.xlu1 %v1685_v27  ;;  %v3261_v26 = vld [vmem:[#allocation20 + $0xd8] sm:$0xff]  }
 0xd7e   : > { %v3262_v27 = vld [vmem:[#allocation20 + $0x18] sm:$0xff]  }
 0xd7f   : > { %v1686_v29 = vmul.f32 %v4457_v28, %v4457_v28 }
 0xd81   : > { %1689 = vadd.xlane.f32.xlu1 %v1686_v29  ;;  %v3264_v29 = vld [vmem:[#allocation20 + $0x60] sm:$0xff]  }
 0xe0a   : > { %v1688_v60 = vpop.xlane.xlu1 %1687 }
 0xe0b   : > { %v1691_v4 = vmul.f32 0.0078125, %v1688_v60 }
 0xe0d   : > { %v1693_v39 = vadd.f32 1e-05, %v1691_v4 }
 0xe0e   : > { %v1690_v42 = vpop.xlane.xlu1 %1689 }
 0xe0f   : > { %3316 = vrsqrt.f32 %v1693_v39  ;;  %v1692_v61 = vmul.f32 0.0078125, %v1690_v42 }
 0xe11   : > { %v1694_v62 = vadd.f32 1e-05, %v1692_v61 }
 0xe13   : > { %3318 = vrsqrt.f32 %v1694_v62 }
 0xe19   : > { %v3317_v63 = vpop.eup %3316 }
 0xe1a   : > { %v1697_v0 = vmul.f32 %v3317_v63, %v4452_v24  ;;  %v3259_v24 = vld [vmem:[#allocation20 + $0x90] sm:$0xff]  }
 0xe1c   : > { %v1705_v3 = vmul.f32 %v2722_v1, %v1697_v0 }
 0xe1d   : > { %v3319_v2 = vpop.eup %3318 }
 0xe1e   : > { %v1698_v13 = vmul.f32 %v3319_v2, %v4457_v28  ;;  %v1713_v7 = vadd.f32 %v2723_v5, %v1705_v3  ;;  %v3263_v28 = vld [vmem:[#allocation20 + $0x98] sm:$0xff]  }
 0xe20   : > { %v1706_v6 = vmul.f32 %v2722_v1, %v1698_v13 }
 0xe22   : > { %v1714_v8 = vadd.f32 %v2723_v5, %v1706_v6 }
 0xe24   : > { %v1715_v9 = vpack.c.bf16 %v1714_v8, %v1713_v7 }
 0xe26   : > { %1963 = vmatmul.mubr.bf16.vlgmr.msra.gmra.mrb[28].mxu0 %v1715_v9  ;;  %2006 = vmatmul.mubr.bf16.vlgmr.msra.gmra.mrb[28].mxu1 %v1715_v9 }
 0xe27   : > { %2834 = vmatpush3.bf16.msra.mxu0 %v3250_v15  ;;  %2856 = vmatpush3.bf16.msra.mxu1 %v3251_v16 }
 0xe28   : > { %2835 = vmatprep.subr.bf16.mxu0 %v3252_v17  ;;  %2857 = vmatprep.subr.bf16.mxu1 %v3253_v18 }
 0xe2b   : > { %2836 = vmatpush3.bf16.msra.mxu0 %v3254_v19  ;;  %2858 = vmatpush3.bf16.msra.mxu1 %v3255_v20 }
 0xe2c   : > { %2837 = vmatprep.subr.bf16.mxu0 %v3256_v21  ;;  %2859 = vmatprep.subr.bf16.mxu1 %v3257_v22 }
 0xe2f   : > { %2838 = vmatpush3.bf16.msra.mxu0 %v3258_v23  ;;  %2860 = vmatpush3.bf16.msra.mxu1 %v3259_v24 }
 0xe30   : > { %2839 = vmatprep.subr.bf16.mxu0 %v3260_v25  ;;  %2861 = vmatprep.subr.bf16.mxu1 %v3261_v26 }
 0xe33   : > { %2840 = vmatpush3.bf16.msra.mxu0 %v3262_v27  ;;  %2862 = vmatpush3.bf16.msra.mxu1 %v3263_v28 }
 0xe34   : > { %2841 = vmatprep.subr.bf16.mxu0 %v3264_v29  ;;  %2863 = vmatprep.subr.bf16.mxu1 %v3265_v31 }
 0xe37   : > { %2842 = vmatpush3.bf16.msra.mxu0 %v3266_v32  ;;  %2864 = vmatpush3.bf16.msra.mxu1 %v3267_v33 }
 0xe38   : > { %2843 = vmatprep.subr.bf16.mxu0 %v3268_v34  ;;  %2865 = vmatprep.subr.bf16.mxu1 %v3269_v35 }
 0xe3b   : > { %2844 = vmatpush3.bf16.msra.mxu0 %v3270_v36  ;;  %2866 = vmatpush3.bf16.msra.mxu1 %v3271_v37 }
 0xe3c   : > { %2845 = vmatprep.subr.bf16.mxu0 %v3272_v38  ;;  %2867 = vmatprep.subr.bf16.mxu1 %v3273_v40 }
 0xe3f   : > { %2846 = vmatpush3.bf16.msra.mxu0 %v3274_v41  ;;  %2868 = vmatpush3.bf16.msra.mxu1 %v3275_v43 }
 0xe40   : > { %2847 = vmatprep.subr.bf16.mxu0 %v3276_v44  ;;  %2869 = vmatprep.subr.bf16.mxu1 %v3277_v45 }
 0xe43   : > { %2848 = vmatpush3.bf16.msra.mxu0 %v3278_v46  ;;  %2870 = vmatpush3.bf16.msra.mxu1 %v3279_v47 }
 0xef9   : > { %v1964_v14 = vpop.f32.mrb[28].mxu0  ;;  %v2007_v57 = vpop.f32.mrb[28].mxu1 }
 0xefa   : > { %v4470_v59 = vadd.f32 %v1964_v14, %v1753_v50  ;;  %v4472_v60 = vadd.f32 %v2007_v57, %v1761_v51  ;;  %v1966_v4 = vpop.f32.mrb[29].mxu0  ;;  %v2009_v39 = vpop.f32.mrb[29].mxu1 }
 0xefb   : > { %v4474_v42 = vadd.f32 %v1966_v4, %v1757_v52  ;;  %v4476_v61 = vadd.f32 %v2009_v39, %v1765_v53  ;;  %v1968_v55 = vpop.f32.mrb[30].mxu0  ;;  %v2011_v62 = vpop.f32.mrb[30].mxu1 }
 0xefc   : > { %v2016_v56 = vmul.f32 %v4470_v59, %v4470_v59  ;;  %v2018_v54 = vmul.f32 %v4472_v60, %v4472_v60  ;;  %v4482_v58 = vadd.f32 %v1968_v55, %v1753_v50  ;;  %v4484_v63 = vadd.f32 %v2011_v62, %v1761_v51  ;;  %v1970_v0 = vpop.f32.mrb[31].mxu0  ;;  %v2013_v1 = vpop.f32.mrb[31].mxu1 }
 0xefd   : > { %v2017_v2 = vmul.f32 %v4474_v42, %v4474_v42  ;;  %v2019_v13 = vmul.f32 %v4476_v61, %v4476_v61  ;;  %v4490_v3 = vadd.f32 %v1970_v0, %v1757_v52  ;;  %v4492_v5 = vadd.f32 %v2013_v1, %v1765_v53 }
 0xefe   : > { %v2024_v6 = vmul.f32 %v2016_v56, %v4470_v59  ;;  %v2026_v7 = vmul.f32 %v2018_v54, %v4472_v60  ;;  %v2020_v8 = vmul.f32 %v4482_v58, %v4482_v58  ;;  %v2022_v9 = vmul.f32 %v4484_v63, %v4484_v63 }
 0xeff   : > { %v2025_v10 = vmul.f32 %v2017_v2, %v4474_v42  ;;  %v2027_v30 = vmul.f32 %v2019_v13, %v4476_v61  ;;  %v2021_v15 = vmul.f32 %v4490_v3, %v4490_v3  ;;  %v2023_v16 = vmul.f32 %v4492_v5, %v4492_v5 }
 0xf00   : > { %v2032_v17 = vmul.f32 0.044715, %v2024_v6  ;;  %v2034_v18 = vmul.f32 0.044715, %v2026_v7  ;;  %v2028_v19 = vmul.f32 %v2020_v8, %v4482_v58  ;;  %v2030_v20 = vmul.f32 %v2022_v9, %v4484_v63 }
 0xf01   : > { %v2033_v21 = vmul.f32 0.044715, %v2025_v10  ;;  %v2035_v22 = vmul.f32 0.044715, %v2027_v30  ;;  %v2029_v23 = vmul.f32 %v2021_v15, %v4490_v3  ;;  %v2031_v24 = vmul.f32 %v2023_v16, %v4492_v5 }
 0xf02   : > { %v2040_v25 = vadd.f32 %v2032_v17, %v4470_v59  ;;  %v2042_v26 = vadd.f32 %v2034_v18, %v4472_v60  ;;  %v2036_v27 = vmul.f32 0.044715, %v2028_v19  ;;  %v2038_v28 = vmul.f32 0.044715, %v2030_v20 }
 0xf03   : > { %v2041_v29 = vadd.f32 %v2033_v21, %v4474_v42  ;;  %v2043_v31 = vadd.f32 %v2035_v22, %v4476_v61  ;;  %v2037_v32 = vmul.f32 0.044715, %v2029_v23  ;;  %v2039_v33 = vmul.f32 0.044715, %v2031_v24 }
 0xf04   : > { %v2048_v34 = vmul.f32 0.7978846, %v2040_v25  ;;  %v2050_v35 = vmul.f32 0.7978846, %v2042_v26  ;;  %v2044_v36 = vadd.f32 %v2036_v27, %v4482_v58  ;;  %v2046_v37 = vadd.f32 %v2038_v28, %v4484_v63 }
 0xf05   : > { %v2049_v38 = vmul.f32 0.7978846, %v2041_v29  ;;  %v2051_v40 = vmul.f32 0.7978846, %v2043_v31  ;;  %v2045_v41 = vadd.f32 %v2037_v32, %v4490_v3  ;;  %v2047_v43 = vadd.f32 %v2039_v33, %v4492_v5 }
 0xf06   : > { %3320 = vtanh.f32 %v2048_v34  ;;  %v2052_v44 = vmul.f32 0.7978846, %v2044_v36  ;;  %v2054_v45 = vmul.f32 0.7978846, %v2046_v37 }
 0xf07   : > { %3322 = vtanh.f32 %v2050_v35  ;;  %v2053_v46 = vmul.f32 0.7978846, %v2045_v41  ;;  %v2055_v47 = vmul.f32 0.7978846, %v2047_v43 }
 0xf08   : > { %3324 = vtanh.f32 %v2049_v38 }
 0xf09   : > { %3326 = vtanh.f32 %v2051_v40 }
 0xf0a   : > { %3328 = vtanh.f32 %v2052_v44 }
 0xf0b   : > { %3330 = vtanh.f32 %v2054_v45 }
 0xf0c   : > { %3332 = vtanh.f32 %v2053_v46 }
 0xf0d   : > { %3334 = vtanh.f32 %v2055_v47 }
 0xf10   : > { %v3321_v48 = vpop.eup %3320 }
 0xf11   : > { %v3323_v49 = vpop.eup %3322  ;;  %v2064_v50 = vadd.f32 1.0, %v3321_v48 }
 0xf12   : > { %v3325_v51 = vpop.eup %3324  ;;  %v2066_v52 = vadd.f32 1.0, %v3323_v49 }
 0xf13   : > { %v3327_v53 = vpop.eup %3326  ;;  %v2065_v14 = vadd.f32 1.0, %v3325_v51  ;;  %v2072_v55 = vmul.f32 0.5, %v2064_v50 }
 0xf14   : > { %v3329_v57 = vpop.eup %3328  ;;  %v2067_v4 = vadd.f32 1.0, %v3327_v53  ;;  %v2074_v54 = vmul.f32 0.5, %v2066_v52 }
 0xf15   : > { %v3331_v39 = vpop.eup %3330  ;;  %v2068_v62 = vadd.f32 1.0, %v3329_v57  ;;  %v2073_v6 = vmul.f32 0.5, %v2065_v14  ;;  %v2080_v10 = vmul.f32 %v2072_v55, %v4470_v59 }
 0xf16   : > { %v3333_v56 = vpop.eup %3332  ;;  %v2070_v0 = vadd.f32 1.0, %v3331_v39  ;;  %v2075_v9 = vmul.f32 0.5, %v2067_v4  ;;  %v2082_v16 = vmul.f32 %v2074_v54, %v4472_v60 }
 0xf17   : > { %v3335_v1 = vpop.eup %3334  ;;  %v2076_v2 = vmul.f32 0.5, %v2068_v62  ;;  %v2069_v13 = vadd.f32 1.0, %v3333_v56  ;;  %v2081_v19 = vmul.f32 %v2073_v6, %v4474_v42 }
 0xf18   : > { %v2078_v7 = vmul.f32 0.5, %v2070_v0  ;;  %v2071_v8 = vadd.f32 1.0, %v3335_v1  ;;  %v2083_v22 = vmul.f32 %v2075_v9, %v4476_v61 }
 0xf19   : > { %v2084_v30 = vmul.f32 %v2076_v2, %v4482_v58  ;;  %v2077_v15 = vmul.f32 0.5, %v2069_v13 }
 0xf1a   : > { %v2086_v17 = vmul.f32 %v2078_v7, %v4484_v63  ;;  %v2079_v18 = vmul.f32 0.5, %v2071_v8  ;;  %v2756_v63 = vld [vmem:[#allocation22] ss:$0 sm:$0xff] }
 0xf1b   : > { %v2085_v20 = vmul.f32 %v2077_v15, %v4490_v3  ;;  %v2088_v21 = vpack.c.bf16 %v2084_v30, %v2080_v10 }
 0xf1c   : > { %v2087_v23 = vmul.f32 %v2079_v18, %v4492_v5  ;;  %v2090_v24 = vpack.c.bf16 %v2086_v17, %v2082_v16 }
 0xf1d   : > { %v2089_v25 = vpack.c.bf16 %v2085_v20, %v2081_v19 }
 0xf1e   : > { %v2091_v59 = vpack.c.bf16 %v2087_v23, %v2083_v22 }
 0xf1f   : > { %2387 = vmatprep.mubr.bf16.mxu0 %v2089_v25 }
 0xf20   : > { %2428 = vmatprep.mubr.bf16.mxu1 %v2091_v59  ;;  %2388 = vmatmul.mubr.bf16.vlgmr.msra.gmra.mrb[32].mxu0 %v2088_v21 }
 0xf21   : > { %2429 = vmatmul.mubr.bf16.vlgmr.msra.gmra.mrb[32].mxu1 %v2090_v24 }
 0xff3   : > { %v2849_v60 = vpop.f32.mrb[32].mxu0 }
 0xff4   : > { %v2871_v58 = vpop.f32.mrb[32].mxu1  ;;  %v2850_v42 = vpop.f32.mrb[33].mxu0 }
 0xff5   : > { %v2851_v26 = vadd.f32 %v2850_v42, %v2849_v60  ;;  %v2872_v3 = vpop.f32.mrb[33].mxu1  ;;  %v2852_v27 = vpop.f32.mrb[34].mxu0 }
 0xff6   : > { %v2873_v28 = vadd.f32 %v2872_v3, %v2871_v58  ;;  %v2874_v61 = vpop.f32.mrb[34].mxu1  ;;  %v2853_v29 = vpop.f32.mrb[35].mxu0 }
 0xff7   : > { %v2390_v5 = vadd.f32 %v2851_v26, %v2756_v63  ;;  %v2854_v31 = vadd.f32 %v2853_v29, %v2852_v27  ;;  %v2875_v32 = vpop.f32.mrb[35].mxu1 }
 0xff8   : > { %v2876_v33 = vadd.f32 %v2875_v32, %v2874_v61 }
 0xff9   : > { %v2431_v34 = vadd.f32 %v2873_v28, %v2390_v5  ;;  %v2393_v35 = vadd.f32 %v2854_v31, %v2756_v63 }
 0xffb   : > { %v2437_v36 = vadd.f32 %v2431_v34, %v4445_v11  ;;  %v2434_v37 = vadd.f32 %v2876_v33, %v2393_v35 }
 0xffd   : > { %2439 = vst [vmem:[%s616_s13] sm:$0xff] %v2437_v36  ;;  %v2438_v38 = vadd.f32 %v2434_v37, %v4448_v12 }
 0xfff   : > { %2440 = vst [vmem:[%s616_s13 + $0x8] sm:$0xff] %v2438_v38 }
0x1000   : > { %3717 = shalt.err (!%p3714_p7)
}
0x1001   : > { %s3718_s13 = scalar_lea.hbm %s4535_s25, 256  ;;  %s3722_s17 = scalar_lea.hbm %s4643_s16, 512 }
0x1002   : > { %p3719_p6 = scmp.ne.s32.totalorder %s4535_s25, %s3718_s13  ;;  %p3723_p13 = scmp.lt.u32.totalorder %s4535_s25, %s4643_s16 }
0x1003   : > { %p3724_p1 = scmp.lt.u32.totalorder %s3722_s17, %s3718_s13  ;;  %p3726_p2 = scmp.lt.u32.totalorder %s3718_s13, %s4535_s25 }
0x1004   : > { %p3720_p9 = pnand %p3719_p6, %p4644_p8 }
0x1005   : > { %p3725_p3 = por %p3724_p1, %p3723_p13 }
0x1006   : > { %p3721_p4 = pneg %p3720_p9 }
0x1007   : > { %p3727_p10 = por %p3726_p2, %p3725_p3 }
0x1009   : > { %p3728_p11 = pnand %p3727_p10, %p3721_p4 }
0x100b   : > { %3731 = shalt.err (!%p3728_p11)
}
0x100c   : > { %s3824_s1 = smov 128   ;;  %s3825_s30 = smov 8  }
0x100d   : > { %3027 = dma.vmem_to_hbm [thread:$0]  (%p4644_p8), %s4530_s19, 256, %s4535_s25, %s2442_s21, %s3824_s1, %s3824_s1, %s3825_s30  }
0x100e PF: > { %s4645_s14 = sld [smem:[#allocation32_spill]]  ;;  %p4646_p12 = scmp.ne.s32.totalorder %s4625_s23, 0 }
0x100f   : > { %p4647_p0 = scmp.ge.s32.totalorder %s3794_s28, 2 }
0x1011   : > { %p3071_p5 = pnand %p4647_p0, %p4646_p12 }
0x1014   : > { %s2470_s20 = sand.u32 1, %s4645_s14  }
0x1015   : > { %s2471_s13 = scalar_lea.sflag [#allocation4], %s2470_s20 }
0x1016   : > { %3777 = dma.done.wait (!%p3071_p5), %s2471_s13, 256  }
0x1017   : > { %3779 = vsyncadd (!%p3071_p5), %s2471_s13, 4294967040  ;;  %p32_p7 = scmp.ge.s32.totalorder %s4187_s18, 4   ;;  %s4648_s25 = smov %s3786_s26 }
0x1018   : > { %s4649_s26 = smov %s3790_s27  ;;  %s4650_s27 = smov %s4198_s29 }
0x1019   : > { %s4651_s28 = smov %s4187_s18  ;;  %34 = sbr.rel (!%p32_p7) target bundleno = 16 (0x10), region = 165 }
0x1020   :  { %2476 = vsyncpa [#allocation3], 1 }
0x1021   :  { %2478 = vsyncpa [#allocation3 + $0x1], 1 }
0x1022   :  { %2479 = vsyncpa [#allocation6], 1 }
0x1023   :  { %2480 = vsyncpa [#allocation9], 1 }
0x1024   :  { %2481 = vsyncpa [#allocation12], 1 }
0x1025   :  { %2482 = vsyncpa [#allocation15], 1 }
0x1026   :  { %2483 = vsyncpa [#allocation18], 1 }
0x1027   :  { %2484 = vsyncpa [#allocation21], 1 }
0x1028   :  { %2485 = vsyncpa [#allocation4], 1 }
0x1029   :  { %2487 = vsyncpa [#allocation4 + $0x1], 1 }

</bundles_post_ra>
